<compile_context>
chip_gen: v6e
topology: v6e:2x2x1
jax: 0.10.0
libtpu: 0.0.40
codegen_flags: <defaults>
</compile_context>

<pallas_src>
import functools
import math

import jax
import jax.numpy as jnp
from jax.experimental import pallas as pl
from jax.experimental.pallas import tpu as pltpu

# ---- config (consistent with the module: dim=32, n_heads=4 -> d_head=8) ----
B = 2
L = 8
D = 32
N_HEADS = 4
N_KV_HEADS = 4          # args.n_kv_heads defaults to n_heads
D_HEAD = D // N_HEADS   # 8

_MXU_PRECISION = jax.lax.Precision.HIGHEST


def positional_encoding(seq_len: int, dim: int) -> jnp.ndarray:
    """Standard sinusoidal positional encoding, shape (L, D)."""
    pos = jnp.arange(seq_len, dtype=jnp.float32)[:, None]
    i = jnp.arange(0, dim, 2, dtype=jnp.float32)
    inv_freq = jnp.exp(-(jnp.log(10000.0)) * i / dim)
    angles = pos * inv_freq[None, :]
    pe = jnp.zeros((seq_len, dim), jnp.float32)
    pe = pe.at[:, 0::2].set(jnp.sin(angles))
    pe = pe.at[:, 1::2].set(jnp.cos(angles))
    return pe


def _self_attention_kernel(x_ref, pe_ref, wqkv_ref, bqkv_ref, wo_ref, bias_ref, o_ref,
                           *, n_heads, d_head):
    """Whole problem in one invocation.

    x_ref    : (N, D)        N = B*L rows (batches stacked along rows)
    pe_ref   : (N, D)        sinusoidal PE tiled per batch element
    wqkv_ref : (D, 3*H*dh)   [Wq | Wk | Wv] fused
    bqkv_ref : (1, 3*H*dh)   [bq | bk | bv] fused
    wo_ref   : (H*dh, D)     original o-projection weight
    bias_ref : (N, N)        additive mask: 0 where attendable, -1e30 elsewhere
                             (causal AND same-batch block-diagonal)
    o_ref    : (N, D)
    """
    hd = n_heads * d_head
    scale = 1.0 / math.sqrt(d_head)

    x = x_ref[...] + pe_ref[...]                                          # (N, D)

    # Fused q/k/v projection: ONE MXU issue with a 96-lane RHS (was 12 tiny per-head
    # matmuls / 3 broadcast-batched einsums).
    qkv = (jnp.dot(x, wqkv_ref[...], precision=_MXU_PRECISION,
                   preferred_element_type=jnp.float32) + bqkv_ref[...])   # (N, 3*H*dh)

    q_all = qkv[:, :hd] * scale          # fold 1/sqrt(d_head) once into q
    k_all = qkv[:, hd:2 * hd]
    v_all = qkv[:, 2 * hd:3 * hd]
    bias = bias_ref[...]                                                  # (N, N)

    # Per-head attention on 2-D lane slices.  4 score matmuls + 4 p@v matmuls -- the
    # same MXU issue count a head-batched (H, N, dh) einsum unrolls to, but with no
    # rank-3 lane<->sublane relayout inside the kernel.
    outs = []
    for h in range(n_heads):
        lo, hi = h * d_head, (h + 1) * d_head
        q_h = q_all[:, lo:hi]                                             # (N, dh)
        k_h = k_all[:, lo:hi]
        v_h = v_all[:, lo:hi]

        s = jnp.einsum('nd,md->nm', q_h, k_h, precision=_MXU_PRECISION,
                       preferred_element_type=jnp.float32) + bias         # (N, N), f32
        s = s - jnp.max(s, axis=-1, keepdims=True)
        p = jnp.exp(s)
        # Exact softmax normalisation (approx reciprocal was outside tolerance);
        # applied to the small (N, dh) output instead of the (N, N) probabilities.
        o_h = jnp.dot(p, v_h, precision=_MXU_PRECISION,
                      preferred_element_type=jnp.float32)                 # (N, dh)
        o_h = o_h / jnp.sum(p, axis=-1, keepdims=True)
        outs.append(o_h)

    # (N, H*dh) head-major along lanes, matching wo's row ordering, so the o-projection
    # (and the sum over heads) is ONE (N, 32) @ (32, D) matmul.
    o_flat = jnp.concatenate(outs, axis=1)
    out = jnp.dot(o_flat, wo_ref[...], precision=_MXU_PRECISION,
                  preferred_element_type=jnp.float32)
    o_ref[...] = out.astype(o_ref.dtype)


def self_attention(x, pe, wq, bq, wk, bk, wv, bv, wo,
                   *, n_heads=N_HEADS, n_kv_heads=N_KV_HEADS):
    Bn, Ln, Dn = x.shape
    d_head = Dn // n_heads
    n_rows = Bn * Ln

    # GQA: expand kv heads wrapper-side (no-op when n_kv_heads == n_heads).
    if n_kv_heads != n_heads:
        rep = n_heads // n_kv_heads
        def expand(w):
            return jnp.repeat(w.reshape(w.shape[0], n_kv_heads, d_head), rep,
                              axis=1).reshape(w.shape[0], n_heads * d_head)
        wk, bk, wv, bv = expand(wk), expand(bk), expand(wv), expand(bv)

    # Fused projection parameters (layout plumbing, done once outside the kernel).
    w_qkv = jnp.concatenate([wq, wk, wv], axis=1)                         # (D, 3*H*dh)
    b_qkv = jnp.concatenate([bq, bk, bv], axis=1)                         # (1, 3*H*dh)

    # (B, L, D) -> (B*L, D): one large row block, no size-1 leading axes.
    x2 = x.reshape(n_rows, Dn)
    pe_rows = jnp.tile(pe, (Bn, 1))                                       # (B*L, D)

    # Precomputed additive mask: causal within each batch block, -1e30 across blocks.
    r = jnp.arange(n_rows)
    allowed = (r[:, None] >= r[None, :]) & ((r[:, None] // Ln) == (r[None, :] // Ln))
    mask_bias = jnp.where(allowed, 0.0, -1e30).astype(jnp.float32)        # (N, N)

    vmem = lambda: pl.BlockSpec(memory_space=pltpu.MemorySpace.VMEM)
    out = pl.pallas_call(
        functools.partial(_self_attention_kernel, n_heads=n_heads, d_head=d_head),
        out_shape=jax.ShapeDtypeStruct((n_rows, Dn), x.dtype),
        in_specs=[vmem() for _ in range(6)],
        out_specs=vmem(),
    )(x2, pe_rows, w_qkv, b_qkv, wo, mask_bias)
    return out.reshape(Bn, Ln, Dn)


def reference(x, pe, wq, bq, wk, bk, wv, bv, wo):
    """Pure-JAX reference matching the PyTorch forward semantics."""
    xb = x + pe[None]
    q = xb @ wq + bq
    k = xb @ wk + bk
    v = xb @ wv + bv
    Bn, Ln, _ = x.shape
    q = q.reshape(Bn, Ln, N_HEADS, D_HEAD).transpose(0, 2, 1, 3)
    k = k.reshape(Bn, Ln, N_KV_HEADS, D_HEAD).transpose(0, 2, 1, 3)
    v = v.reshape(Bn, Ln, N_KV_HEADS, D_HEAD).transpose(0, 2, 1, 3)
    s = jnp.einsum("bhld,bhmd->bhlm", q, k) / math.sqrt(D_HEAD)
    mask = jnp.tril(jnp.ones((Ln, Ln), bool))
    s = jnp.where(mask, s, -1e30)
    p = jax.nn.softmax(s, axis=-1)
    o = jnp.einsum("bhlm,bhmd->bhld", p, v)
    o = o.transpose(0, 2, 1, 3).reshape(Bn, Ln, N_HEADS * D_HEAD)
    return o @ wo


if __name__ == "__main__":
    key = jax.random.PRNGKey(0)
    kx, kq, kbq, kk, kbk, kv, kbv, ko = jax.random.split(key, 8)

    x = jax.random.normal(kx, (B, L, D), jnp.float32)
    init_scale = 1.0 / math.sqrt(D)
    wq = jax.random.normal(kq, (D, N_HEADS * D_HEAD), jnp.float32) * init_scale
    bq = jax.random.normal(kbq, (1, N_HEADS * D_HEAD), jnp.float32) * init_scale
    wk = jax.random.normal(kk, (D, N_KV_HEADS * D_HEAD), jnp.float32) * init_scale
    bk = jax.random.normal(kbk, (1, N_KV_HEADS * D_HEAD), jnp.float32) * init_scale
    wv = jax.random.normal(kv, (D, N_KV_HEADS * D_HEAD), jnp.float32) * init_scale
    bv = jax.random.normal(kbv, (1, N_KV_HEADS * D_HEAD), jnp.float32) * init_scale
    wo = jax.random.normal(ko, (N_HEADS * D_HEAD, D), jnp.float32) * init_scale

    pe = positional_encoding(L, D)

    out = self_attention(x, pe, wq, bq, wk, bk, wv, bv, wo)
    out = jax.block_until_ready(out)
    assert out.shape == (B, L, D)

    # Golden reference at full f32 matmul precision (the kernel's matmuls also request
    # Precision.HIGHEST).  Observed agreement is ~1e-5; the tolerance leaves margin for
    # MXU pass-count / transcendental differences vs. the XLA-compiled reference while
    # staying ~2 orders of magnitude below the O(1) output scale.
    with jax.default_matmul_precision("float32"):
        ref = reference(x, pe, wq, bq, wk, bk, wv, bv, wo)
    assert jnp.allclose(out, ref, rtol=5e-3, atol=5e-3), "mismatch vs reference"
    print("KERNEL_OK")
</pallas_src>

<mosaic_0001>
module attributes {stable_mosaic.version = 11 : i64} {
  func.func @_self_attention_kernel(%arg0: memref<16x32xf32, #tpu.memory_space<vmem>>, %arg1: memref<16x32xf32, #tpu.memory_space<vmem>>, %arg2: memref<32x96xf32, #tpu.memory_space<vmem>>, %arg3: memref<1x96xf32, #tpu.memory_space<vmem>>, %arg4: memref<32x32xf32, #tpu.memory_space<vmem>>, %arg5: memref<16x16xf32, #tpu.memory_space<vmem>>, %arg6: memref<16x32xf32, #tpu.memory_space<vmem>>) attributes {dimension_semantics = [], scalar_prefetch = 0 : i64, scratch_operands = 0 : i64, tpu.core_type = #tpu.core_type<tc>} {
    %c0 = arith.constant 0 : index
    %c0_0 = arith.constant 0 : index
    %0 = vector.load %arg0[%c0, %c0_0] : memref<16x32xf32, #tpu.memory_space<vmem>>, vector<16x32xf32>
    %c0_1 = arith.constant 0 : index
    %c0_2 = arith.constant 0 : index
    %1 = vector.load %arg1[%c0_1, %c0_2] : memref<16x32xf32, #tpu.memory_space<vmem>>, vector<16x32xf32>
    %2 = arith.addf %0, %1 : vector<16x32xf32>
    %c0_3 = arith.constant 0 : index
    %c0_4 = arith.constant 0 : index
    %3 = vector.load %arg2[%c0_3, %c0_4] : memref<32x96xf32, #tpu.memory_space<vmem>>, vector<32x96xf32>
    %cst = arith.constant dense<0.000000e+00> : vector<16x96xf32>
    %4 = tpu.matmul %2, %3, %cst {dimension_numbers = #tpu.dot_dimension_numbers<[1], [0], [0], [1], [0, 0, 1, 1], [], []>, precision = #tpu.contract_precision<fp32>} : vector<16x32xf32>, vector<32x96xf32>, vector<16x96xf32> -> vector<16x96xf32>
    %c0_5 = arith.constant 0 : index
    %c0_6 = arith.constant 0 : index
    %5 = vector.load %arg3[%c0_5, %c0_6] : memref<1x96xf32, #tpu.memory_space<vmem>>, vector<1x96xf32>
    %6 = vector.broadcast %5 : vector<1x96xf32> to vector<16x96xf32>
    %7 = arith.addf %4, %6 : vector<16x96xf32>
    %8 = vector.extract_strided_slice %7 {offsets = [0, 0], sizes = [16, 32], strides = [1, 1]} : vector<16x96xf32> to vector<16x32xf32>
    %cst_7 = arith.constant 0.353553385 : f32
    %9 = vector.broadcast %cst_7 : f32 to vector<16x32xf32>
    %10 = arith.mulf %8, %9 : vector<16x32xf32>
    %11 = vector.extract_strided_slice %7 {offsets = [0, 32], sizes = [16, 32], strides = [1, 1]} : vector<16x96xf32> to vector<16x32xf32>
    %12 = vector.extract_strided_slice %7 {offsets = [0, 64], sizes = [16, 32], strides = [1, 1]} : vector<16x96xf32> to vector<16x32xf32>
    %c0_8 = arith.constant 0 : index
    %c0_9 = arith.constant 0 : index
    %13 = vector.load %arg5[%c0_8, %c0_9] : memref<16x16xf32, #tpu.memory_space<vmem>>, vector<16x16xf32>
    %14 = vector.extract_strided_slice %10 {offsets = [0, 0], sizes = [16, 8], strides = [1, 1]} : vector<16x32xf32> to vector<16x8xf32>
    %15 = vector.extract_strided_slice %11 {offsets = [0, 0], sizes = [16, 8], strides = [1, 1]} : vector<16x32xf32> to vector<16x8xf32>
    %16 = vector.extract_strided_slice %12 {offsets = [0, 0], sizes = [16, 8], strides = [1, 1]} : vector<16x32xf32> to vector<16x8xf32>
    "tpu.trace_start"() <{level = 10 : i32, message = "nd,md->nm"}> : () -> ()
    %cst_10 = arith.constant dense<0.000000e+00> : vector<16x16xf32>
    %17 = tpu.matmul %14, %15, %cst_10 {dimension_numbers = #tpu.dot_dimension_numbers<[1], [1], [0], [0], [0, 0, 1, 0], [], []>, precision = #tpu.contract_precision<fp32>} : vector<16x8xf32>, vector<16x8xf32>, vector<16x16xf32> -> vector<16x16xf32>
    "tpu.trace_stop"() : () -> ()
    %18 = arith.addf %17, %13 : vector<16x16xf32>
    %cst_11 = arith.constant dense<0xFF800000> : vector<16xf32>
    %19 = vector.multi_reduction <maximumf>, %18, %cst_11 [1] : vector<16x16xf32> to vector<16xf32>
    %20 = vector.shape_cast %19 : vector<16xf32> to vector<16x1xf32>
    %21 = vector.broadcast %20 : vector<16x1xf32> to vector<16x16xf32>
    %22 = arith.subf %18, %21 : vector<16x16xf32>
    %23 = math.exp %22 : vector<16x16xf32>
    %cst_12 = arith.constant dense<0.000000e+00> : vector<16x8xf32>
    %24 = tpu.matmul %23, %16, %cst_12 {dimension_numbers = #tpu.dot_dimension_numbers<[1], [0], [0], [1], [0, 0, 1, 1], [], []>, precision = #tpu.contract_precision<fp32>} : vector<16x16xf32>, vector<16x8xf32>, vector<16x8xf32> -> vector<16x8xf32>
    %cst_13 = arith.constant dense<0.000000e+00> : vector<16xf32>
    %25 = vector.multi_reduction <add>, %23, %cst_13 [1] : vector<16x16xf32> to vector<16xf32>
    %26 = vector.shape_cast %25 : vector<16xf32> to vector<16x1xf32>
    %27 = vector.broadcast %26 : vector<16x1xf32> to vector<16x8xf32>
    %28 = arith.divf %24, %27 : vector<16x8xf32>
    %29 = vector.extract_strided_slice %10 {offsets = [0, 8], sizes = [16, 8], strides = [1, 1]} : vector<16x32xf32> to vector<16x8xf32>
    %30 = vector.extract_strided_slice %11 {offsets = [0, 8], sizes = [16, 8], strides = [1, 1]} : vector<16x32xf32> to vector<16x8xf32>
    %31 = vector.extract_strided_slice %12 {offsets = [0, 8], sizes = [16, 8], strides = [1, 1]} : vector<16x32xf32> to vector<16x8xf32>
    "tpu.trace_start"() <{level = 10 : i32, message = "nd,md->nm"}> : () -> ()
    %cst_14 = arith.constant dense<0.000000e+00> : vector<16x16xf32>
    %32 = tpu.matmul %29, %30, %cst_14 {dimension_numbers = #tpu.dot_dimension_numbers<[1], [1], [0], [0], [0, 0, 1, 0], [], []>, precision = #tpu.contract_precision<fp32>} : vector<16x8xf32>, vector<16x8xf32>, vector<16x16xf32> -> vector<16x16xf32>
    "tpu.trace_stop"() : () -> ()
    %33 = arith.addf %32, %13 : vector<16x16xf32>
    %cst_15 = arith.constant dense<0xFF800000> : vector<16xf32>
    %34 = vector.multi_reduction <maximumf>, %33, %cst_15 [1] : vector<16x16xf32> to vector<16xf32>
    %35 = vector.shape_cast %34 : vector<16xf32> to vector<16x1xf32>
    %36 = vector.broadcast %35 : vector<16x1xf32> to vector<16x16xf32>
    %37 = arith.subf %33, %36 : vector<16x16xf32>
    %38 = math.exp %37 : vector<16x16xf32>
    %cst_16 = arith.constant dense<0.000000e+00> : vector<16x8xf32>
    %39 = tpu.matmul %38, %31, %cst_16 {dimension_numbers = #tpu.dot_dimension_numbers<[1], [0], [0], [1], [0, 0, 1, 1], [], []>, precision = #tpu.contract_precision<fp32>} : vector<16x16xf32>, vector<16x8xf32>, vector<16x8xf32> -> vector<16x8xf32>
    %cst_17 = arith.constant dense<0.000000e+00> : vector<16xf32>
    %40 = vector.multi_reduction <add>, %38, %cst_17 [1] : vector<16x16xf32> to vector<16xf32>
    %41 = vector.shape_cast %40 : vector<16xf32> to vector<16x1xf32>
    %42 = vector.broadcast %41 : vector<16x1xf32> to vector<16x8xf32>
    %43 = arith.divf %39, %42 : vector<16x8xf32>
    %44 = vector.extract_strided_slice %10 {offsets = [0, 16], sizes = [16, 8], strides = [1, 1]} : vector<16x32xf32> to vector<16x8xf32>
    %45 = vector.extract_strided_slice %11 {offsets = [0, 16], sizes = [16, 8], strides = [1, 1]} : vector<16x32xf32> to vector<16x8xf32>
    %46 = vector.extract_strided_slice %12 {offsets = [0, 16], sizes = [16, 8], strides = [1, 1]} : vector<16x32xf32> to vector<16x8xf32>
    "tpu.trace_start"() <{level = 10 : i32, message = "nd,md->nm"}> : () -> ()
    %cst_18 = arith.constant dense<0.000000e+00> : vector<16x16xf32>
    %47 = tpu.matmul %44, %45, %cst_18 {dimension_numbers = #tpu.dot_dimension_numbers<[1], [1], [0], [0], [0, 0, 1, 0], [], []>, precision = #tpu.contract_precision<fp32>} : vector<16x8xf32>, vector<16x8xf32>, vector<16x16xf32> -> vector<16x16xf32>
    "tpu.trace_stop"() : () -> ()
    %48 = arith.addf %47, %13 : vector<16x16xf32>
    %cst_19 = arith.constant dense<0xFF800000> : vector<16xf32>
    %49 = vector.multi_reduction <maximumf>, %48, %cst_19 [1] : vector<16x16xf32> to vector<16xf32>
    %50 = vector.shape_cast %49 : vector<16xf32> to vector<16x1xf32>
    %51 = vector.broadcast %50 : vector<16x1xf32> to vector<16x16xf32>
    %52 = arith.subf %48, %51 : vector<16x16xf32>
    %53 = math.exp %52 : vector<16x16xf32>
    %cst_20 = arith.constant dense<0.000000e+00> : vector<16x8xf32>
    %54 = tpu.matmul %53, %46, %cst_20 {dimension_numbers = #tpu.dot_dimension_numbers<[1], [0], [0], [1], [0, 0, 1, 1], [], []>, precision = #tpu.contract_precision<fp32>} : vector<16x16xf32>, vector<16x8xf32>, vector<16x8xf32> -> vector<16x8xf32>
    %cst_21 = arith.constant dense<0.000000e+00> : vector<16xf32>
    %55 = vector.multi_reduction <add>, %53, %cst_21 [1] : vector<16x16xf32> to vector<16xf32>
    %56 = vector.shape_cast %55 : vector<16xf32> to vector<16x1xf32>
    %57 = vector.broadcast %56 : vector<16x1xf32> to vector<16x8xf32>
    %58 = arith.divf %54, %57 : vector<16x8xf32>
    %59 = vector.extract_strided_slice %10 {offsets = [0, 24], sizes = [16, 8], strides = [1, 1]} : vector<16x32xf32> to vector<16x8xf32>
    %60 = vector.extract_strided_slice %11 {offsets = [0, 24], sizes = [16, 8], strides = [1, 1]} : vector<16x32xf32> to vector<16x8xf32>
    %61 = vector.extract_strided_slice %12 {offsets = [0, 24], sizes = [16, 8], strides = [1, 1]} : vector<16x32xf32> to vector<16x8xf32>
    "tpu.trace_start"() <{level = 10 : i32, message = "nd,md->nm"}> : () -> ()
    %cst_22 = arith.constant dense<0.000000e+00> : vector<16x16xf32>
    %62 = tpu.matmul %59, %60, %cst_22 {dimension_numbers = #tpu.dot_dimension_numbers<[1], [1], [0], [0], [0, 0, 1, 0], [], []>, precision = #tpu.contract_precision<fp32>} : vector<16x8xf32>, vector<16x8xf32>, vector<16x16xf32> -> vector<16x16xf32>
    "tpu.trace_stop"() : () -> ()
    %63 = arith.addf %62, %13 : vector<16x16xf32>
    %cst_23 = arith.constant dense<0xFF800000> : vector<16xf32>
    %64 = vector.multi_reduction <maximumf>, %63, %cst_23 [1] : vector<16x16xf32> to vector<16xf32>
    %65 = vector.shape_cast %64 : vector<16xf32> to vector<16x1xf32>
    %66 = vector.broadcast %65 : vector<16x1xf32> to vector<16x16xf32>
    %67 = arith.subf %63, %66 : vector<16x16xf32>
    %68 = math.exp %67 : vector<16x16xf32>
    %cst_24 = arith.constant dense<0.000000e+00> : vector<16x8xf32>
    %69 = tpu.matmul %68, %61, %cst_24 {dimension_numbers = #tpu.dot_dimension_numbers<[1], [0], [0], [1], [0, 0, 1, 1], [], []>, precision = #tpu.contract_precision<fp32>} : vector<16x16xf32>, vector<16x8xf32>, vector<16x8xf32> -> vector<16x8xf32>
    %cst_25 = arith.constant dense<0.000000e+00> : vector<16xf32>
    %70 = vector.multi_reduction <add>, %68, %cst_25 [1] : vector<16x16xf32> to vector<16xf32>
    %71 = vector.shape_cast %70 : vector<16xf32> to vector<16x1xf32>
    %72 = vector.broadcast %71 : vector<16x1xf32> to vector<16x8xf32>
    %73 = arith.divf %69, %72 : vector<16x8xf32>
    %74 = tpu.concatenate %28, %43, %58, %73 in 1 : vector<16x8xf32>, vector<16x8xf32>, vector<16x8xf32>, vector<16x8xf32> -> vector<16x32xf32>
    %c0_26 = arith.constant 0 : index
    %c0_27 = arith.constant 0 : index
    %75 = vector.load %arg4[%c0_26, %c0_27] : memref<32x32xf32, #tpu.memory_space<vmem>>, vector<32x32xf32>
    %cst_28 = arith.constant dense<0.000000e+00> : vector<16x32xf32>
    %76 = tpu.matmul %74, %75, %cst_28 {dimension_numbers = #tpu.dot_dimension_numbers<[1], [0], [0], [1], [0, 0, 1, 1], [], []>, precision = #tpu.contract_precision<fp32>} : vector<16x32xf32>, vector<32x32xf32>, vector<16x32xf32> -> vector<16x32xf32>
    %c0_29 = arith.constant 0 : index
    %c0_30 = arith.constant 0 : index
    %77 = vector.load %arg6[%c0_29, %c0_30] : memref<16x32xf32, #tpu.memory_space<vmem>>, vector<16x32xf32>
    tpu.vector_store %arg6[%c0_29, %c0_30], %76 {strides = array<i32>} : memref<16x32xf32, #tpu.memory_space<vmem>>, vector<16x32xf32>,
    return
  }
}

</mosaic_0001>

<bundles_post_ra>
// kernel: tpu_custom_call.1
= control target key start
LH: loop header
LB: loop body
LE: loop exit
PB: predicated region body
PF: predicated region fallthrough
CT: control target
= control target key end

     0   :  { %11 = vsyncpa [#allocation3], 0  ;;  %s6960_s0 = inlined_call_operand.hbm [shape: f32[16,32], index: 0, kind: input, shape index: {}]   ;;  %s6961_s1 = inlined_call_operand.hbm [shape: f32[16,32], index: 1, kind: input, shape index: {}]   ;;  %s6962_s2 = inlined_call_operand.hbm [shape: f32[32,96], index: 2, kind: input, shape index: {}]   ;;  %s6963_s3 = inlined_call_operand.vmem [shape: f32[1,96], index: 3, kind: input, shape index: {}]   ;;  %s6964_s4 = inlined_call_operand.hbm [shape: f32[32,32], index: 4, kind: input, shape index: {}]   ;;  %s6965_s5 = inlined_call_operand.hbm [shape: f32[16,16], index: 5, kind: input, shape index: {}]   ;;  %s6966_s6 = inlined_call_operand.hbm [shape: f32[16,32], index: 6, kind: output, shape index: {}]  }
   0x1   :  { %12 = vsyncpa [#allocation6], 0 }
   0x2   :  { %13 = vsyncpa [#allocation9], 0 }
   0x3   :  { %14 = vsyncpa [#allocation4], 0  ;;  %s6372_s21 = smov [#allocation5]   ;;  %s6373_s23 = smov [#allocation8]  }
   0x4   :  { %s32_s22 = sshll.u32 %s6372_s21, 4  ;;  %s58_s24 = sshll.u32 %s6373_s23, 4  ;;  %s33_s22 = int_to_ptr.vmem [resolvable:$true] %s32_s22  ;;  %s59_s24 = int_to_ptr.vmem [resolvable:$true] %s58_s24 }
   0x5   :  { %s6252_s25 = scalar_lea.vmem %s33_s22, 256  ;;  %p6257_p1 = scmp.lt.s32.totalorder %s33_s22, %s33_s22 }
   0x6   :  { %p6253_p0 = scmp.ne.s32.totalorder %s33_s22, %s6252_s25  ;;  %p6258_p2 = scmp.lt.s32.totalorder %s6252_s25, %s6252_s25 }
   0x8   :  { %p6259_p3 = por %p6258_p2, %p6257_p1 }
   0xa   :  { %p6260_p4 = pnand %p6259_p3, %p6253_p0 }
   0xc   :  { %6263 = shalt.err (!%p6260_p4)
}
   0xd   :  { %s6374_s26 = smov 128   ;;  %s6375_s27 = smov 8  }
   0xe   :  { %38 = dma.hbm_to_vmem [thread:$0]  %s6961_s1, 256, %s33_s22, [#allocation6], %s6374_s26, %s6374_s26, %s6375_s27  }
   0xf   :  { %s6272_s30 = scalar_lea.vmem %s59_s24, 512  ;;  %p6277_p6 = scmp.lt.s32.totalorder %s59_s24, %s59_s24 }
  0x10   :  { %p6273_p5 = scmp.ne.s32.totalorder %s59_s24, %s6272_s30  ;;  %p6278_p7 = scmp.lt.s32.totalorder %s6272_s30, %s6272_s30 }
  0x12   :  { %p6279_p8 = por %p6278_p7, %p6277_p6 }
  0x14   :  { %p6280_p9 = pnand %p6279_p8, %p6273_p5 }
  0x16   :  { %6283 = shalt.err (!%p6280_p9)
}
  0x17   :  { %64 = dma.hbm_to_vmem [thread:$0]  %s6964_s4, 512, %s59_s24, [#allocation9], %s6374_s26, %s6374_s26, %s6375_s27  }
  0x18   :  { %s6376_s9 = smov [#allocation2]   ;;  %s6377_s11 = smov [#allocation7]  }
  0x19   :  { %s20_s10 = sshll.u32 %s6376_s9, 4  ;;  %s44_s12 = sshll.u32 %s6377_s11, 4  ;;  %s21_s10 = int_to_ptr.vmem [resolvable:$true] %s20_s10  ;;  %s45_s12 = int_to_ptr.vmem [resolvable:$true] %s44_s12 }
  0x1a   :  { %s6292_s1 = scalar_lea.vmem %s21_s10, 256  ;;  %p6297_p11 = scmp.lt.s32.totalorder %s21_s10, %s21_s10 }
  0x1b   :  { %p6293_p10 = scmp.ne.s32.totalorder %s21_s10, %s6292_s1  ;;  %p6298_p12 = scmp.lt.s32.totalorder %s6292_s1, %s6292_s1 }
  0x1d   :  { %p6299_p13 = por %p6298_p12, %p6297_p11 }
  0x1f   :  { %p6300_p0 = pnand %p6299_p13, %p6293_p10 }
  0x21   :  { %6303 = shalt.err (!%p6300_p0)
}
  0x22   :  { %26 = dma.hbm_to_vmem [thread:$0]  %s6960_s0, 256, %s21_s10, [#allocation3], %s6374_s26, %s6374_s26, %s6375_s27  }
  0x23   :  { %s6312_s4 = scalar_lea.vmem %s45_s12, 512  ;;  %p6317_p2 = scmp.lt.s32.totalorder %s45_s12, %s45_s12 }
  0x24   :  { %p6313_p1 = scmp.ne.s32.totalorder %s45_s12, %s6312_s4  ;;  %p6318_p3 = scmp.lt.s32.totalorder %s6312_s4, %s6312_s4 }
  0x26   :  { %p6319_p4 = por %p6318_p3, %p6317_p2 }
  0x28   :  { %p6320_p5 = pnand %p6319_p4, %p6313_p1 }
  0x2a   :  { %6323 = shalt.err (!%p6320_p5)
}
  0x2b   :  { %50 = dma.hbm_to_vmem [thread:$0]  %s6962_s2, 512, %s45_s12, [#allocation6], %s6374_s26, %s6374_s26, %s6375_s27  }
  0x2c   :  { %s6378_s17 = smov [#allocation10]  }
  0x2d   :  { %s70_s18 = sshll.u32 %s6378_s17, 4  ;;  %s71_s18 = int_to_ptr.vmem [resolvable:$true] %s70_s18 }
  0x2e   :  { %s6332_s19 = scalar_lea.vmem %s71_s18, 256  ;;  %p6337_p7 = scmp.lt.s32.totalorder %s71_s18, %s71_s18 }
  0x2f   :  { %p6333_p6 = scmp.ne.s32.totalorder %s71_s18, %s6332_s19  ;;  %p6338_p8 = scmp.lt.s32.totalorder %s6332_s19, %s6332_s19 }
  0x31   :  { %p6339_p9 = por %p6338_p8, %p6337_p7 }
  0x33   :  { %p6340_p10 = pnand %p6339_p9, %p6333_p6 }
  0x35   :  { %6343 = shalt.err (!%p6340_p10)
}
  0x36   :  { %76 = dma.hbm_to_vmem [thread:$0]  %s6965_s5, 256, %s71_s18, [#allocation9], %s6374_s26, %s6374_s26, %s6375_s27  }
  0x37   :  { %6364 = dma.done.wait [#allocation3], 256  }
  0x38   :  { %6365 = vsyncadd [#allocation3], 4294967040 }
  0x39   :  { %6366 = dma.done.wait [#allocation6], 768  }
  0x3a   :  { %6367 = vsyncadd [#allocation6], 4294966528 }
  0x3b   :  { %6368 = dma.done.wait [#allocation9], 768  }
  0x3c   :  { %6369 = vsyncadd [#allocation9], 4294966528  ;;  %v101_v0 = vld [vmem:[#allocation7 + $0x18] sm:$0xff]  ;;  %v100_v1 = vld [vmem:[#allocation7 + $0x10] sm:$0xff]  ;;  %vm109_vm0 = vcmask 261120   ;;  %vm654_vm1 = vcmask 64512  }
  0x3d   :  { %v99_v2 = vld [vmem:[#allocation7 + $0x8] sm:$0xff]  ;;  %v6458_v3 = vand.u32 4294901760, %v101_v0  ;;  %v6460_v4 = vand.u32 4294901760, %v100_v1  ;;  %v98_v6 = vld [vmem:[#allocation7] sm:$0xff]  ;;  %v94_v8 = vld [vmem:[#allocation5] sm:$0xff]  ;;  %s6380_s21 = smov 64  }
  0x3e   :  { %v6462_v5 = vand.u32 4294901760, %v99_v2  ;;  %v92_v7 = vld [vmem:[#allocation2] sm:$0xff]  ;;  %v6464_v9 = vand.u32 4294901760, %v98_v6  ;;  %v93_v11 = vld [vmem:[#allocation2 + $0x8] sm:$0xff]  ;;  %v95_v12 = vld [vmem:[#allocation5 + $0x8] sm:$0xff]  ;;  %s6381_s22 = smov 88  }
  0x3f   :  { %v96_v10 = vadd.f32 %v94_v8, %v92_v7  ;;  %5721 = vmatprep.subr.mxu0 %v6458_v3  ;;  %v231_v13 = vsub.f32 %v101_v0, %v6458_v3  ;;  %v238_v14 = vsub.f32 %v100_v1, %v6460_v4  ;;  %v97_v15 = vadd.f32 %v95_v12, %v93_v11  ;;  %v5456_v43 = vld [vmem:[%s6963_s3] ss:$0 sm:$0xff]  ;;  %s6379_s3 = smov 96   ;;  %s6382_s23 = smov 120  }
  0x40   :  { %v245_v16 = vsub.f32 %v99_v2, %v6462_v5  ;;  %5722 = vmatpush3.msra.mxu0 %v6458_v3  ;;  %v252_v18 = vsub.f32 %v98_v6, %v6464_v9  ;;  %vm1167_vm2 = vcmask 130048   ;;  %s6383_s24 = smov 56   ;;  %s6384_s25 = smov 80   ;;  %vm4894_vm3 = vcmask 195584  }
  0x41   :  { %v111_v17 = vsel %vm109_vm0, %v96_v10, 0  ;;  %5723 = vmatprep.subr.mxu0 %v6460_v4  ;;  %v232_v19 = vand.u32 4294901760, %v231_v13  ;;  %v239_v20 = vand.u32 4294901760, %v238_v14  ;;  %v114_v22 = vsel %vm109_vm0, %v97_v15, 0  ;;  %s6385_s28 = smov 112   ;;  %s6386_s29 = smov 48  }
  0x42   :  { %v6474_v21 = vand.u32 4294901760, %v111_v17  ;;  %5724 = vmatpush3.msra.mxu0 %v6460_v4  ;;  %v6478_v23 = vand.u32 4294901760, %v114_v22  ;;  %v246_v24 = vand.u32 4294901760, %v245_v16  ;;  %v253_v25 = vand.u32 4294901760, %v252_v18  ;;  %s6387_s30 = smov 72   ;;  %s6388_s7 = smov 104  }
  0x43   :  { %5725 = vmatprep.subr.mxu0 %v6462_v5  ;;  %v233_v26 = vsub.f32 %v231_v13, %v232_v19  ;;  %v240_v27 = vsub.f32 %v238_v14, %v239_v20  ;;  %s6389_s8 = smov 40   ;;  %s6390_s9 = smov 16  }
  0x44   :  { %v186_v28 = vsub.f32 %v111_v17, %v6474_v21  ;;  %5740 = vmatprep.mubr.f32.mxu1 %v6474_v21  ;;  %5726 = vmatpush3.msra.mxu0 %v6462_v5  ;;  %v196_v29 = vsub.f32 %v114_v22, %v6478_v23  ;;  %v247_v30 = vsub.f32 %v245_v16, %v246_v24  ;;  %s6391_s10 = smov 24   ;;  %s6392_s11 = smov [#allocation11]  }
  0x45   :  { %v234_v31 = vand.u32 4294901760, %v233_v26  ;;  %5727 = vmatprep.subr.mxu0 %v6464_v9  ;;  %v241_v32 = vand.u32 4294901760, %v240_v27  ;;  %v254_v34 = vsub.f32 %v252_v18, %v253_v25  ;;  %s5442_s12 = sshll.u32 %s6392_s11, 4  ;;  %s5443_s12 = int_to_ptr.vmem [resolvable:$true] %s5442_s12 }
  0x46   :  { %v187_v33 = vand.u32 4294901760, %v186_v28  ;;  %5728 = vmatpush3.msra.mxu0 %v6464_v9  ;;  %v197_v35 = vand.u32 4294901760, %v196_v29  ;;  %v248_v37 = vand.u32 4294901760, %v247_v30  ;;  %s6344_s1 = scalar_lea.vmem %s5443_s12, 256  ;;  %p6349_p12 = scmp.lt.s32.totalorder %s5443_s12, %s5443_s12 }
  0x47   :  { %5732 = vmatprep.subr.mxu1 %v234_v31  ;;  %5743 = vmatprep.subr.mxu0 %v231_v13  ;;  %v255_v40 = vand.u32 4294901760, %v254_v34  ;;  %p6345_p11 = scmp.ne.s32.totalorder %s5443_s12, %s6344_s1  ;;  %p6350_p13 = scmp.lt.s32.totalorder %s6344_s1, %s6344_s1 }
  0x48   :  { %v188_v36 = vsub.f32 %v186_v28, %v187_v33  ;;  %5733 = vmatpush3.msra.mxu1 %v234_v31  ;;  %v198_v38 = vsub.f32 %v196_v29, %v197_v35 }
  0x49   :  { %5734 = vmatprep.subr.mxu1 %v241_v32  ;;  %p6351_p0 = por %p6350_p13, %p6349_p12 }
  0x4a   :  { %v189_v39 = vand.u32 4294901760, %v188_v36  ;;  %5735 = vmatpush3.msra.mxu1 %v241_v32  ;;  %v199_v41 = vand.u32 4294901760, %v198_v38  ;;  %v6553_v38 = vld [vmem:[#allocation10 + $0x8] sm:$0xff] }
  0x4b   :  { %5736 = vmatprep.subr.mxu1 %v248_v37  ;;  %p6352_p1 = pnand %p6351_p0, %p6345_p11 }
  0x4c   :  { %5729 = vmatprep.mubr.f32.mxu0 %v189_v39  ;;  %5737 = vmatpush3.msra.mxu1 %v248_v37 }
  0x4d   :  { %5730 = vmatmul.mubr.f32.vlgmr.msra.gmra.mxu0 %v199_v41  ;;  %5738 = vmatprep.subr.mxu1 %v255_v40  ;;  %v6555_v41 = vld [vmem:[#allocation10] sm:$0xff] }
  0x4e   :  { %5744 = vmatpush3.msra.mxu0 %v231_v13  ;;  %5739 = vmatpush3.msra.mxu1 %v255_v40 }
  0x4f   :  { %5745 = vmatprep.subr.mxu0 %v238_v14  ;;  %5741 = vmatmul.mubr.f32.vlgmr.msra.gmra.mxu1 %v6478_v23 }
  0x50   :  { %5746 = vmatpush3.msra.mxu0 %v238_v14  ;;  %5754 = vmatprep.subr.mxu1 %v6458_v3 }
  0x51   :  { %5747 = vmatprep.subr.mxu0 %v245_v16  ;;  %5755 = vmatpush3.msra.mxu1 %v6458_v3 }
  0x52   :  { %5748 = vmatpush3.msra.mxu0 %v245_v16  ;;  %5751 = vmatprep.mubr.f32.mxu0 %v186_v28 }
  0x53   :  { %5749 = vmatprep.subr.mxu0 %v252_v18  ;;  %5756 = vmatprep.subr.mxu1 %v6460_v4 }
  0x54   :  { %5750 = vmatpush3.msra.mxu0 %v252_v18  ;;  %5757 = vmatpush3.msra.mxu1 %v6460_v4 }
  0x55   :  { %5752 = vmatmul.mubr.f32.vlgmr.msra.gmra.mxu0 %v196_v29  ;;  %5765 = vmatprep.subr.mxu0 %v232_v19 }
  0x56   :  { %5758 = vmatprep.subr.mxu1 %v6462_v5  ;;  %5766 = vmatpush3.msra.mxu0 %v232_v19 }
  0x57   :  { %5759 = vmatpush3.msra.mxu1 %v6462_v5  ;;  %5767 = vmatprep.subr.mxu0 %v239_v20 }
  0x58   :  { %5760 = vmatprep.subr.mxu1 %v6464_v9  ;;  %5768 = vmatpush3.msra.mxu0 %v239_v20 }
  0x59   :  { %5761 = vmatpush3.msra.mxu1 %v6464_v9  ;;  %5762 = vmatprep.mubr.f32.mxu1 %v187_v33 }
  0x5a   :  { %5769 = vmatprep.subr.mxu0 %v246_v24  ;;  %5763 = vmatmul.mubr.f32.vlgmr.msra.gmra.mxu1 %v197_v35 }
  0x5b   :  { %5770 = vmatpush3.msra.mxu0 %v246_v24  ;;  %5776 = vmatprep.subr.mxu1 %v6458_v3 }
  0x5c   :  { %5771 = vmatprep.subr.mxu0 %v253_v25  ;;  %5777 = vmatpush3.msra.mxu1 %v6458_v3 }
  0x5d   :  { %5772 = vmatpush3.msra.mxu0 %v253_v25  ;;  %5773 = vmatprep.mubr.f32.mxu0 %v6474_v21 }
  0x5e   :  { %5778 = vmatprep.subr.mxu1 %v6460_v4  ;;  %5774 = vmatmul.mubr.f32.vlgmr.msra.gmra.mxu0 %v6478_v23 }
  0x5f   :  { %5779 = vmatpush3.msra.mxu1 %v6460_v4  ;;  %5784 = vmatprep.mubr.f32.mxu1 %v6474_v21 }
  0x60   :  { %5780 = vmatprep.subr.mxu1 %v6462_v5 }
  0x61   :  { %5781 = vmatpush3.msra.mxu1 %v6462_v5 }
  0x62   :  { %5782 = vmatprep.subr.mxu1 %v6464_v9 }
  0x63   :  { %5783 = vmatpush3.msra.mxu1 %v6464_v9 }
  0x64   :  { %5785 = vmatmul.mubr.f32.vlgmr.msra.gmra.mxu1 %v6478_v23 }
 0x10d   :  { %v5731_v42 = vpop.f32.mrf.mxu0 }
 0x10e   :  { %v202_v46 = vadd.f32 %v5731_v42, %v5456_v43 }
 0x10f   :  { %v191_v44 = vpop.f32.mrf.mxu0  ;;  %v5742_v45 = vpop.f32.mrf.mxu1 }
 0x110   :  { %v192_v47 = vadd.f32 %v5456_v43, %v191_v44  ;;  %v299_v50 = vadd.f32 %v5742_v45, %v202_v46 }
 0x111   :  { %v292_v48 = vpop.f32.mrf.mxu1 }
 0x112   :  { %v293_v51 = vadd.f32 %v292_v48, %v192_v47 }
 0x115   :  { %v5753_v49 = vpop.f32.mrf.mxu0 }
 0x116   :  { %v386_v54 = vadd.f32 %v5753_v49, %v299_v50 }
 0x117   :  { %v378_v53 = vpop.f32.mrf.mxu0 }
 0x118   :  { %v379_v56 = vadd.f32 %v378_v53, %v293_v51 }
 0x11a   :  { %v5764_v52 = vpop.f32.mrf.mxu1 }
 0x11b   :  { %v471_v57 = vadd.f32 %v5764_v52, %v386_v54 }
 0x11c   :  { %v462_v55 = vpop.f32.mrf.mxu1 }
 0x11d   :  { %v463_v59 = vadd.f32 %v462_v55, %v379_v56 }
 0x11e   :  { %v5775_v58 = vpop.f32.mrf.mxu0 }
 0x11f   :  { %v560_v61 = vadd.f32 %v5775_v58, %v471_v57 }
 0x120   :  { %v553_v60 = vpop.f32.mrf.mxu0 }
 0x121   :  { %v554_v63 = vadd.f32 %v553_v60, %v463_v59 }
 0x124   :  { %v5786_v62 = vpop.f32.mrf.mxu1 }
 0x125   :  { %v6511_v0 = vadd.f32 %v5786_v62, %v560_v61 }
 0x126   :  { %v634_v1 = vpop.f32.mrf.mxu1 }
 0x127   :  { %v6513_v2 = vadd.f32 %v634_v1, %v554_v63  ;;  %652 = vrot.lane.b32.xlu0 %v6511_v0, %s6379_s3  ;;  %v6532_v10 = vmul.f32 0.35355338, %v6511_v0 }
 0x129   :  { %v6517_v3 = vmul.f32 0.35355338, %v6513_v2  ;;  %v659_v11 = vsel %vm654_vm1, %v6532_v10, 0 }
 0x12a   :  { %v742_v12 = vand.u32 4294901760, %v659_v11 }
 0x12b   :  { %650 = vrot.lane.b32.xlu0 %v6513_v2, %s6379_s3  ;;  %v656_v4 = vsel %vm654_vm1, %v6517_v3, 0 }
 0x12c   :  { %v6522_v5 = vand.u32 4294901760, %v656_v4  ;;  %v743_v13 = vsub.f32 %v659_v11, %v742_v12 }
 0x12e   :  { %5798 = vmatprep.mubr.f32.mxu1 %v6522_v5  ;;  %v733_v6 = vsub.f32 %v656_v4, %v6522_v5  ;;  %v744_v17 = vand.u32 4294901760, %v743_v13 }
 0x12f   :  { %1182 = vrot.lane.b32.xlu0 %v6511_v0, %s6380_s21 }
 0x130   :  { %v734_v7 = vand.u32 4294901760, %v733_v6  ;;  %v745_v23 = vsub.f32 %v743_v13, %v744_v17 }
 0x132   :  { %v735_v8 = vsub.f32 %v733_v6, %v734_v7  ;;  %v746_v27 = vand.u32 4294901760, %v745_v23 }
 0x133   :  { %1710 = vrot.lane.b32.xlu0 %v6511_v0, %s6381_s22 }
 0x134   :  { %v736_v9 = vand.u32 4294901760, %v735_v8 }
 0x136   :  { %5791 = vmatprep.mubr.f32.mxu0 %v736_v9 }
 0x137   :  { %1708 = vrot.lane.b32.xlu0 %v6513_v2, %s6381_s22 }
 0x13b   :  { %1704 = vrot.lane.b32.xlu0 %v6517_v3, %s6382_s23 }
 0x13f   :  { %1706 = vrot.lane.b32.xlu0 %v6532_v10, %s6382_s23 }
 0x199   :  { %v653_v14 = vpop.permute.xlu0 %652 }
 0x19a   :  { %v663_v15 = vsel %vm654_vm1, %v653_v14, 0 }
 0x19b   :  { %v694_v16 = vand.u32 4294901760, %v663_v15 }
 0x19d   :  { %v782_v18 = vsub.f32 %v663_v15, %v694_v16  ;;  %5787 = vmatprep.subr.mxu0 %v694_v16  ;;  %v651_v19 = vpop.permute.xlu0 %650 }
 0x19e   :  { %v661_v20 = vsel %vm654_vm1, %v651_v19, 0  ;;  %5788 = vmatpush3.xpose.msra.mxu0 %v694_v16 }
 0x19f   :  { %v697_v21 = vand.u32 4294901760, %v661_v20  ;;  %v783_v22 = vand.u32 4294901760, %v782_v18 }
 0x1a1   :  { %v789_v24 = vsub.f32 %v661_v20, %v697_v21  ;;  %5789 = vmatprep.subr.mxu0 %v697_v21  ;;  %v784_v25 = vsub.f32 %v782_v18, %v783_v22  ;;  %v1183_v30 = vpop.permute.xlu0 %1182 }
 0x1a2   :  { %5790 = vmatpush3.xpose.msra.mxu0 %v697_v21  ;;  %v6539_v32 = vand.u32 4294901760, %v1183_v30 }
 0x1a3   :  { %5801 = vmatprep.subr.mxu0 %v782_v18  ;;  %v785_v26 = vand.u32 4294901760, %v784_v25  ;;  %v790_v28 = vand.u32 4294901760, %v789_v24 }
 0x1a4   :  { %v6542_v33 = vsub.f32 %v1183_v30, %v6539_v32 }
 0x1a5   :  { %5794 = vmatprep.subr.mxu1 %v785_v26  ;;  %5792 = vmatmul.mubr.f32.vlgmr.msra.gmra.mxu0 %v746_v27  ;;  %v791_v29 = vsub.f32 %v789_v24, %v790_v28  ;;  %v1711_v11 = vpop.permute.xlu0 %1710 }
 0x1a6   :  { %5795 = vmatpush3.xpose.msra.mxu1 %v785_v26  ;;  %5802 = vmatpush3.xpose.msra.mxu0 %v782_v18  ;;  %v6546_v34 = vand.u32 4294901760, %v6542_v33 }
 0x1a7   :  { %5805 = vmatprep.mubr.f32.mxu0 %v733_v6  ;;  %5803 = vmatprep.subr.mxu0 %v789_v24  ;;  %v792_v31 = vand.u32 4294901760, %v791_v29 }
 0x1a8   :  { %v1311_v35 = vsub.f32 %v6542_v33, %v6546_v34 }
 0x1a9   :  { %5796 = vmatprep.subr.mxu1 %v792_v31 }
 0x1aa   :  { %5797 = vmatpush3.xpose.msra.mxu1 %v792_v31  ;;  %5804 = vmatpush3.xpose.msra.mxu0 %v789_v24  ;;  %v1312_v36 = vand.u32 4294901760, %v1311_v35 }
 0x1ab   :  { %5808 = vmatprep.subr.mxu1 %v694_v16  ;;  %5815 = vmatprep.subr.mxu0 %v783_v22 }
 0x1ad   :  { %5799 = vmatmul.mubr.f32.vlgmr.msra.gmra.mxu1 %v742_v12  ;;  %5806 = vmatmul.mubr.f32.vlgmr.msra.gmra.mxu0 %v743_v13 }
 0x1ae   :  { %5809 = vmatpush3.xpose.msra.mxu1 %v694_v16  ;;  %5812 = vmatprep.mubr.f32.mxu1 %v734_v7 }
 0x1af   :  { %5816 = vmatpush3.xpose.msra.mxu0 %v783_v22  ;;  %5819 = vmatprep.mubr.f32.mxu0 %v6522_v5 }
 0x1b0   :  { %5810 = vmatprep.subr.mxu1 %v697_v21  ;;  %5817 = vmatprep.subr.mxu0 %v790_v28 }
 0x1b2   :  { %5811 = vmatpush3.xpose.msra.mxu1 %v697_v21 }
 0x1b3   :  { %5818 = vmatpush3.xpose.msra.mxu0 %v790_v28  ;;  %5822 = vmatprep.subr.mxu1 %v694_v16 }
 0x1b4   :  { %5829 = vmatprep.subr.mxu0 %v6539_v32 }
 0x1b5   :  { %5813 = vmatmul.mubr.f32.vlgmr.msra.gmra.mxu1 %v744_v17  ;;  %v1709_v17 = vpop.permute.xlu0 %1708 }
 0x1b6   :  { %5820 = vmatmul.mubr.f32.vlgmr.msra.gmra.mxu0 %v742_v12  ;;  %5823 = vmatpush3.xpose.msra.mxu1 %v694_v16  ;;  %v1718_v16 = vsel %vm654_vm1, %v1711_v11, 0  ;;  %v1716_v20 = vsel %vm654_vm1, %v1709_v17, 0 }
 0x1b7   :  { %5826 = vmatprep.mubr.f32.mxu1 %v6522_v5  ;;  %5830 = vmatpush3.msra.mxu0 %v6539_v32  ;;  %v6572_v19 = vand.u32 4294901760, %v1718_v16  ;;  %v6579_v24 = vand.u32 4294901760, %v1716_v20 }
 0x1b8   :  { %5824 = vmatprep.subr.mxu1 %v697_v21 }
 0x1b9   :  { %v6584_v26 = vsub.f32 %v1718_v16, %v6572_v19  ;;  %v1705_v29 = vpop.permute.xlu0 %1704  ;;  %v6593_v31 = vsub.f32 %v1716_v20, %v6579_v24 }
 0x1ba   :  { %5825 = vmatpush3.xpose.msra.mxu1 %v697_v21 }
 0x1bb   :  { %5836 = vmatprep.subr.mxu1 %v1312_v36 }
 0x1bd   :  { %5827 = vmatmul.mubr.f32.vlgmr.msra.gmra.mxu1 %v742_v12 }
 0x1be   :  { %5837 = vmatpush3.msra.mxu1 %v1312_v36 }
 0x265   :  { %v5793_v37 = vpop.f32.mrf.mxu0 }
 0x266   :  { %v749_v42 = vadd.f32 %v5793_v37, %v6553_v38  ;;  %v6596_v37 = vand.u32 4294901760, %v6584_v26 }
 0x267   :  { %v738_v40 = vpop.f32.mrf.mxu0 }
 0x268   :  { %v739_v44 = vadd.f32 %v738_v40, %v6555_v41 }
 0x26d   :  { %v5800_v39 = vpop.f32.mrf.mxu1  ;;  %v5807_v46 = vpop.f32.mrf.mxu0 }
 0x26e   :  { %v836_v45 = vadd.f32 %v5800_v39, %v749_v42  ;;  %v1712_v39 = vsel %vm654_vm1, %v1705_v29, 0 }
 0x26f   :  { %v829_v43 = vpop.f32.mrf.mxu1  ;;  %v911_v50 = vpop.f32.mrf.mxu0 }
 0x270   :  { %v830_v47 = vadd.f32 %v829_v43, %v739_v44  ;;  %v919_v49 = vadd.f32 %v5807_v46, %v836_v45  ;;  %v6602_v43 = vand.u32 4294901760, %v6593_v31  ;;  %v6604_v44 = vand.u32 4294901760, %v1712_v39  ;;  %v1707_v45 = vpop.permute.xlu0 %1706 }
 0x271   :  { %v1839_v46 = vsub.f32 %v6584_v26, %v6596_v37 }
 0x272   :  { %v912_v52 = vadd.f32 %v911_v50, %v830_v47 }
 0x275   :  { %v5814_v48 = vpop.f32.mrf.mxu1 }
 0x276   :  { %v1002_v53 = vadd.f32 %v5814_v48, %v919_v49  ;;  %v5821_v54 = vpop.f32.mrf.mxu0  ;;  %v1714_v49 = vsel %vm654_vm1, %v1707_v45, 0 }
 0x277   :  { %v993_v51 = vpop.f32.mrf.mxu1 }
 0x278   :  { %v994_v55 = vadd.f32 %v993_v51, %v912_v52  ;;  %v1085_v56 = vadd.f32 %v5821_v54, %v1002_v53  ;;  %v1078_v57 = vpop.f32.mrf.mxu0  ;;  %v1846_v51 = vsub.f32 %v6593_v31, %v6602_v43  ;;  %v1788_v52 = vsub.f32 %v1712_v39, %v6604_v44 }
 0x279   :  { %v1840_v53 = vand.u32 4294901760, %v1839_v46 }
 0x27a   :  { %v1079_v59 = vadd.f32 %v1078_v57, %v994_v55  ;;  %v1797_v55 = vand.u32 4294901760, %v1714_v49 }
 0x27c   :  { %v1798_v57 = vsub.f32 %v1714_v49, %v1797_v55 }
 0x27d   :  { %v5828_v58 = vpop.f32.mrf.mxu1 }
 0x27e   :  { %v1164_v60 = vadd.f32 %v5828_v58, %v1085_v56  ;;  %v1789_v56 = vand.u32 4294901760, %v1788_v52  ;;  %v1799_v58 = vand.u32 4294901760, %v1798_v57 }
 0x27f   :  { %v1157_v61 = vpop.f32.mrf.mxu1 }
 0x280   :  { %v1158_v62 = vadd.f32 %v1157_v61, %v1079_v59  ;;  %v1171_v63 = vsel %vm1167_vm2, %v1164_v60, -inf }
 0x281   :  { %1172 = vmax.xlane.f32.xlu1 %v1171_v63 }
 0x282   :  { %v1168_v1 = vsel %vm1167_vm2, %v1158_v62, -inf }
 0x285   :  { %1169 = vmax.xlane.f32.xlu1 %v1168_v1 }
 0x296   :  { %1180 = vrot.lane.b32.xlu1 %v6513_v2, %s6380_s21 }
 0x30a   :  { %v1173_v4 = vpop.xlane.xlu1 %1172 }
 0x30b   :  { %v1175_v5 = vsub.f32 %v1164_v60, %v1173_v4 }
 0x30d   :  { %v1178_v6 = vmul.f32 1.442695, %v1175_v5 }
 0x30e   :  { %v1170_v7 = vpop.xlane.xlu1 %1169 }
 0x30f   :  { %6210 = vpow2.f32 %v1178_v6  ;;  %v1174_v8 = vsub.f32 %v1158_v62, %v1170_v7 }
 0x311   :  { %v1176_v9 = vmul.f32 1.442695, %v1174_v8 }
 0x312   :  { %v1181_v12 = vpop.permute.xlu1 %1180 }
 0x313   :  { %6212 = vpow2.f32 %v1176_v9  ;;  %v1224_v13 = vand.u32 4294901760, %v1181_v12 }
 0x315   :  { %v6563_v14 = vsub.f32 %v1181_v12, %v1224_v13  ;;  %5831 = vmatprep.subr.mxu0 %v1224_v13 }
 0x316   :  { %5832 = vmatpush3.msra.mxu0 %v1224_v13 }
 0x317   :  { %5843 = vmatprep.subr.mxu0 %v6542_v33  ;;  %v6567_v15 = vand.u32 4294901760, %v6563_v14 }
 0x319   :  { %v1318_v18 = vsub.f32 %v6563_v14, %v6567_v15 }
 0x31b   :  { %v1319_v21 = vand.u32 4294901760, %v1318_v18 }
 0x31c   :  { %v6575_v22 = vpop.eup %6210 }
 0x31d   :  { %5838 = vmatprep.subr.mxu1 %v1319_v21  ;;  %v1190_v23 = vsel %vm1167_vm2, %v6575_v22, 0 }
 0x31e   :  { %5839 = vmatpush3.msra.mxu1 %v1319_v21  ;;  %v6581_v25 = vand.u32 4294901760, %v1190_v23 }
 0x31f   :  { %5850 = vmatprep.subr.mxu1 %v6539_v32 }
 0x320   :  { %v6587_v27 = vpop.eup %6212  ;;  %v1270_v28 = vsub.f32 %v1190_v23, %v6581_v25 }
 0x321   :  { %v1187_v30 = vsel %vm1167_vm2, %v6587_v27, 0 }
 0x322   :  { %v1259_v35 = vand.u32 4294901760, %v1187_v30  ;;  %v1271_v36 = vand.u32 4294901760, %v1270_v28 }
 0x324   :  { %5840 = vmatprep.mubr.f32.mxu1 %v1259_v35  ;;  %v1260_v40 = vsub.f32 %v1187_v30, %v1259_v35  ;;  %v1272_v47 = vsub.f32 %v1270_v28, %v1271_v36 }
 0x325   :  { %5841 = vmatmul.mubr.f32.vlgmr.msra.gmra.mxu1 %v6581_v25 }
 0x326   :  { %5851 = vmatpush3.msra.mxu1 %v6539_v32  ;;  %v1261_v42 = vand.u32 4294901760, %v1260_v40  ;;  %v1273_v54 = vand.u32 4294901760, %v1272_v47 }
 0x327   :  { %5852 = vmatprep.subr.mxu1 %v1224_v13 }
 0x328   :  { %5853 = vmatpush3.msra.mxu1 %v1224_v13  ;;  %5854 = vmatprep.mubr.f32.mxu1 %v1261_v42  ;;  %v1262_v48 = vsub.f32 %v1260_v40, %v1261_v42 }
 0x329   :  { %5864 = vmatprep.subr.mxu1 %v6539_v32  ;;  %5855 = vmatmul.mubr.f32.vlgmr.msra.gmra.mxu1 %v1271_v36 }
 0x32a   :  { %5865 = vmatpush3.msra.mxu1 %v6539_v32  ;;  %5868 = vmatprep.mubr.f32.mxu1 %v1259_v35  ;;  %v1263_v50 = vand.u32 4294901760, %v1262_v48  ;;  %v1847_v32 = vand.u32 4294901760, %v1846_v51 }
 0x32b   :  { %5866 = vmatprep.subr.mxu1 %v1224_v13 }
 0x32c   :  { %5867 = vmatpush3.msra.mxu1 %v1224_v13  ;;  %5833 = vmatprep.mubr.f32.mxu0 %v1263_v50 }
 0x32d   :  { %5878 = vmatprep.subr.mxu1 %v1840_v53  ;;  %5834 = vmatmul.mubr.f32.vlgmr.msra.gmra.mxu0 %v1273_v54 }
 0x32e   :  { %5844 = vmatpush3.msra.mxu0 %v6542_v33  ;;  %5869 = vmatmul.mubr.f32.vlgmr.msra.gmra.mxu1 %v6581_v25  ;;  %v1790_v33 = vsub.f32 %v1788_v52, %v1789_v56 }
 0x32f   :  { %5879 = vmatpush3.xpose.msra.mxu1 %v1840_v53  ;;  %5845 = vmatprep.subr.mxu0 %v6563_v14 }
 0x330   :  { %5847 = vmatprep.mubr.f32.mxu0 %v1260_v40  ;;  %5880 = vmatprep.subr.mxu1 %v1847_v32  ;;  %v1791_v59 = vand.u32 4294901760, %v1790_v33 }
 0x331   :  { %5882 = vmatprep.mubr.f32.mxu1 %v6604_v44  ;;  %5846 = vmatpush3.msra.mxu0 %v6563_v14 }
 0x332   :  { %5857 = vmatprep.subr.mxu0 %v6546_v34  ;;  %5848 = vmatmul.mubr.f32.vlgmr.msra.gmra.mxu0 %v1270_v28 }
 0x333   :  { %5858 = vmatpush3.msra.mxu0 %v6546_v34  ;;  %5881 = vmatpush3.xpose.msra.mxu1 %v1847_v32  ;;  %v1800_v34 = vsub.f32 %v1798_v57, %v1799_v58 }
 0x334   :  { %5859 = vmatprep.subr.mxu0 %v6567_v15  ;;  %5861 = vmatprep.mubr.f32.mxu0 %v1259_v35 }
 0x335   :  { %5892 = vmatprep.subr.mxu1 %v6572_v19  ;;  %5860 = vmatpush3.msra.mxu0 %v6567_v15  ;;  %v1801_v60 = vand.u32 4294901760, %v1800_v34 }
 0x336   :  { %5871 = vmatprep.subr.mxu0 %v6572_v19  ;;  %5883 = vmatmul.mubr.f32.vlgmr.msra.gmra.mxu1 %v1797_v55 }
 0x337   :  { %5862 = vmatmul.mubr.f32.vlgmr.msra.gmra.mxu0 %v6581_v25  ;;  %5893 = vmatpush3.xpose.msra.mxu1 %v6572_v19 }
 0x338   :  { %5872 = vmatpush3.xpose.msra.mxu0 %v6572_v19  ;;  %5896 = vmatprep.mubr.f32.mxu1 %v1789_v56 }
 0x339   :  { %5873 = vmatprep.subr.mxu0 %v6579_v24  ;;  %5875 = vmatprep.mubr.f32.mxu0 %v1791_v59 }
 0x33a   :  { %5894 = vmatprep.subr.mxu1 %v6579_v24 }
 0x33b   :  { %5895 = vmatpush3.xpose.msra.mxu1 %v6579_v24 }
 0x33c   :  { %5874 = vmatpush3.xpose.msra.mxu0 %v6579_v24  ;;  %5906 = vmatprep.subr.mxu1 %v6572_v19 }
 0x33d   :  { %5885 = vmatprep.subr.mxu0 %v6584_v26 }
 0x33e   :  { %5897 = vmatmul.mubr.f32.vlgmr.msra.gmra.mxu1 %v1799_v58 }
 0x33f   :  { %5876 = vmatmul.mubr.f32.vlgmr.msra.gmra.mxu0 %v1801_v60  ;;  %5907 = vmatpush3.xpose.msra.mxu1 %v6572_v19 }
 0x340   :  { %5886 = vmatpush3.xpose.msra.mxu0 %v6584_v26  ;;  %5889 = vmatprep.mubr.f32.mxu0 %v1788_v52 }
 0x341   :  { %5910 = vmatprep.mubr.f32.mxu1 %v6604_v44  ;;  %5887 = vmatprep.subr.mxu0 %v6593_v31 }
 0x342   :  { %5908 = vmatprep.subr.mxu1 %v6579_v24 }
 0x343   :  { %5909 = vmatpush3.xpose.msra.mxu1 %v6579_v24 }
 0x344   :  { %5888 = vmatpush3.xpose.msra.mxu0 %v6593_v31 }
 0x345   :  { %5899 = vmatprep.subr.mxu0 %v6596_v37 }
 0x346   :  { %5911 = vmatmul.mubr.f32.vlgmr.msra.gmra.mxu1 %v1797_v55 }
 0x347   :  { %5890 = vmatmul.mubr.f32.vlgmr.msra.gmra.mxu0 %v1798_v57 }
 0x348   :  { %5900 = vmatpush3.xpose.msra.mxu0 %v6596_v37  ;;  %5903 = vmatprep.mubr.f32.mxu0 %v6604_v44 }
 0x349   :  { %5901 = vmatprep.subr.mxu0 %v6602_v43 }
 0x34c   :  { %5902 = vmatpush3.xpose.msra.mxu0 %v6602_v43 }
 0x34f   :  { %5904 = vmatmul.mubr.f32.vlgmr.msra.gmra.mxu0 %v1797_v55 }
 0x3e5   :  { %v5842_v61 = vpop.f32.mrf.mxu1 }
 0x3e7   :  { %v1356_v62 = vpop.f32.mrf.mxu1 }
 0x3e9   :  { %v5856_v4 = vpop.f32.mrf.mxu1 }
 0x3eb   :  { %v1520_v8 = vpop.f32.mrf.mxu1 }
 0x3ed   :  { %v5835_v63 = vpop.f32.mrf.mxu0 }
 0x3ee   :  { %v1363_v1 = vadd.f32 %v5842_v61, %v5835_v63  ;;  %v5870_v14 = vpop.f32.mrf.mxu1 }
 0x3ef   :  { %v1265_v5 = vpop.f32.mrf.mxu0 }
 0x3f0   :  { %v1357_v6 = vadd.f32 %v1356_v62, %v1265_v5  ;;  %v1684_v21 = vpop.f32.mrf.mxu1 }
 0x3f2   :  { %v5849_v7 = vpop.f32.mrf.mxu0 }
 0x3f3   :  { %v1446_v9 = vadd.f32 %v5849_v7, %v1363_v1 }
 0x3f4   :  { %v1438_v11 = vpop.f32.mrf.mxu0 }
 0x3f5   :  { %v1439_v12 = vadd.f32 %v1438_v11, %v1357_v6  ;;  %v1529_v13 = vadd.f32 %v5856_v4, %v1446_v9 }
 0x3f6   :  { %v5884_v25 = vpop.f32.mrf.mxu1 }
 0x3f7   :  { %v5863_v15 = vpop.f32.mrf.mxu0  ;;  %v1521_v16 = vadd.f32 %v1520_v8, %v1439_v12 }
 0x3f8   :  { %v1612_v17 = vadd.f32 %v5863_v15, %v1529_v13  ;;  %v1884_v30 = vpop.f32.mrf.mxu1 }
 0x3f9   :  { %v1605_v18 = vpop.f32.mrf.mxu0 }
 0x3fa   :  { %v6646_v19 = vadd.f32 %v5870_v14, %v1612_v17  ;;  %v1606_v20 = vadd.f32 %v1605_v18, %v1521_v16 }
 0x3fc   :  { %v6648_v23 = vadd.f32 %v1684_v21, %v1606_v20 }
 0x3fe   :  { %v5898_v36 = vpop.f32.mrf.mxu1 }
 0x3ff   :  { %v5877_v24 = vpop.f32.mrf.mxu0 }
 0x400   :  { %v1804_v28 = vadd.f32 %v5877_v24, %v6553_v38  ;;  %v2048_v43 = vpop.f32.mrf.mxu1 }
 0x401   :  { %v1793_v26 = vpop.f32.mrf.mxu0 }
 0x402   :  { %v1794_v29 = vadd.f32 %v1793_v26, %v6555_v41  ;;  %v1891_v35 = vadd.f32 %v5884_v25, %v1804_v28 }
 0x404   :  { %v1885_v40 = vadd.f32 %v1884_v30, %v1794_v29 }
 0x406   :  { %v5912_v45 = vpop.f32.mrf.mxu1 }
 0x407   :  { %v5891_v31 = vpop.f32.mrf.mxu0 }
 0x408   :  { %v1974_v39 = vadd.f32 %v5891_v31, %v1891_v35  ;;  %v2212_v52 = vpop.f32.mrf.mxu1 }
 0x409   :  { %v1966_v37 = vpop.f32.mrf.mxu0 }
 0x40a   :  { %v1967_v42 = vadd.f32 %v1966_v37, %v1885_v40  ;;  %v2057_v44 = vadd.f32 %v5898_v36, %v1974_v39 }
 0x40c   :  { %v2049_v48 = vadd.f32 %v2048_v43, %v1967_v42 }
 0x40f   :  { %v5905_v46 = vpop.f32.mrf.mxu0 }
 0x410   :  { %v2140_v47 = vadd.f32 %v5905_v46, %v2057_v44 }
 0x411   :  { %v2133_v49 = vpop.f32.mrf.mxu0 }
 0x412   :  { %v2134_v50 = vadd.f32 %v2133_v49, %v2049_v48  ;;  %v2219_v51 = vadd.f32 %v5912_v45, %v2140_v47 }
 0x414   :  { %v2225_v53 = vsel %vm1167_vm2, %v2219_v51, -inf  ;;  %v2213_v54 = vadd.f32 %v2212_v52, %v2134_v50 }
 0x415   :  { %2226 = vmax.xlane.f32.xlu0 %v2225_v53 }
 0x416   :  { %v2222_v55 = vsel %vm1167_vm2, %v2213_v54, -inf }
 0x417   :  { %2223 = vmax.xlane.f32.xlu1 %v2222_v55 }
 0x428   :  { %2234 = vrot.lane.b32.xlu1 %v6513_v2, %s6383_s24 }
 0x42b   :  { %2236 = vrot.lane.b32.xlu0 %v6511_v0, %s6383_s24 }
 0x42c   :  { %2764 = vrot.lane.b32.xlu1 %v6511_v0, %s6384_s25 }
 0x42f   :  { %2762 = vrot.lane.b32.xlu0 %v6513_v2, %s6384_s25 }
 0x430   :  { %2758 = vrot.lane.b32.xlu1 %v6517_v3, %s6385_s28 }
 0x433   :  { %2760 = vrot.lane.b32.xlu0 %v6532_v10, %s6385_s28 }
 0x49e   :  { %v2227_v32 = vpop.xlane.xlu0 %2226 }
 0x49f   :  { %v2229_v56 = vsub.f32 %v2219_v51, %v2227_v32 }
 0x4a0   :  { %v2224_v57 = vpop.xlane.xlu1 %2223 }
 0x4a1   :  { %v2232_v33 = vmul.f32 1.442695, %v2229_v56  ;;  %v2228_v58 = vsub.f32 %v2213_v54, %v2224_v57 }
 0x4a2   :  { %v2237_v59 = vpop.permute.xlu0 %2236 }
 0x4a3   :  { %6214 = vpow2.f32 %v2232_v33  ;;  %v2230_v34 = vmul.f32 1.442695, %v2228_v58  ;;  %v2275_v60 = vand.u32 4294901760, %v2237_v59 }
 0x4a4   :  { %v2235_v61 = vpop.permute.xlu1 %2234 }
 0x4a5   :  { %6216 = vpow2.f32 %v2230_v34  ;;  %v6660_v62 = vsub.f32 %v2237_v59, %v2275_v60  ;;  %v2278_v63 = vand.u32 4294901760, %v2235_v61  ;;  %5913 = vmatprep.subr.mxu0 %v2275_v60 }
 0x4a6   :  { %5914 = vmatpush3.msra.mxu0 %v2275_v60  ;;  %v2763_v8 = vpop.permute.xlu0 %2762 }
 0x4a7   :  { %v6662_v1 = vsub.f32 %v2235_v61, %v2278_v63  ;;  %5915 = vmatprep.subr.mxu0 %v2278_v63  ;;  %v6665_v4 = vand.u32 4294901760, %v6660_v62  ;;  %v2770_v13 = vsel %vm654_vm1, %v2763_v8, 0 }
 0x4a8   :  { %5916 = vmatpush3.msra.mxu0 %v2278_v63  ;;  %v2765_v5 = vpop.permute.xlu1 %2764  ;;  %v6681_v17 = vand.u32 4294901760, %v2770_v13 }
 0x4a9   :  { %5927 = vmatprep.subr.mxu0 %v6660_v62  ;;  %v2365_v6 = vsub.f32 %v6660_v62, %v6665_v4  ;;  %v6671_v7 = vand.u32 4294901760, %v6662_v1  ;;  %v2772_v9 = vsel %vm654_vm1, %v2765_v5, 0 }
 0x4aa   :  { %v6677_v14 = vand.u32 4294901760, %v2772_v9  ;;  %v6693_v28 = vsub.f32 %v2770_v13, %v6681_v17  ;;  %v2761_v42 = vpop.permute.xlu0 %2760 }
 0x4ab   :  { %v2366_v11 = vand.u32 4294901760, %v2365_v6  ;;  %v2372_v12 = vsub.f32 %v6662_v1, %v6671_v7  ;;  %v2768_v47 = vsel %vm654_vm1, %v2761_v42, 0 }
 0x4ac   :  { %v6684_v18 = vsub.f32 %v2772_v9, %v6677_v14  ;;  %v2759_v25 = vpop.permute.xlu1 %2758  ;;  %v6700_v40 = vand.u32 4294901760, %v6693_v28  ;;  %v2851_v53 = vand.u32 4294901760, %v2768_v47 }
 0x4ad   :  { %5920 = vmatprep.subr.mxu1 %v2366_v11  ;;  %v2373_v15 = vand.u32 4294901760, %v2372_v12  ;;  %v2766_v35 = vsel %vm654_vm1, %v2759_v25, 0 }
 0x4ae   :  { %5921 = vmatpush3.msra.mxu1 %v2366_v11  ;;  %v6696_v31 = vand.u32 4294901760, %v6684_v18  ;;  %v6702_v43 = vand.u32 4294901760, %v2766_v35  ;;  %v2900_v49 = vsub.f32 %v6693_v28, %v6700_v40  ;;  %v2852_v32 = vsub.f32 %v2768_v47, %v2851_v53 }
 0x4af   :  { %5922 = vmatprep.subr.mxu1 %v2373_v15 }
 0x4b0   :  { %v6679_v16 = vpop.eup %6214  ;;  %5923 = vmatpush3.msra.mxu1 %v2373_v15  ;;  %v2893_v44 = vsub.f32 %v6684_v18, %v6696_v31  ;;  %v2842_v50 = vsub.f32 %v2766_v35, %v6702_v43  ;;  %v2901_v54 = vand.u32 4294901760, %v2900_v49  ;;  %v2853_v57 = vand.u32 4294901760, %v2852_v32 }
 0x4b1   :  { %5934 = vmatprep.subr.mxu1 %v2275_v60  ;;  %v2244_v20 = vsel %vm1167_vm2, %v6679_v16, 0 }
 0x4b2   :  { %v6688_v21 = vpop.eup %6216  ;;  %v2323_v24 = vand.u32 4294901760, %v2244_v20  ;;  %v2894_v51 = vand.u32 4294901760, %v2893_v44  ;;  %v2843_v55 = vand.u32 4294901760, %v2842_v50  ;;  %v2854_v58 = vsub.f32 %v2852_v32, %v2853_v57 }
 0x4b3   :  { %v2241_v26 = vsel %vm1167_vm2, %v6688_v21, 0 }
 0x4b4   :  { %v2313_v29 = vand.u32 4294901760, %v2241_v26  ;;  %v2324_v30 = vsub.f32 %v2244_v20, %v2323_v24  ;;  %v2844_v56 = vsub.f32 %v2842_v50, %v2843_v55  ;;  %v2855_v59 = vand.u32 4294901760, %v2854_v58 }
 0x4b6   :  { %5924 = vmatprep.mubr.f32.mxu1 %v2313_v29  ;;  %v2314_v36 = vsub.f32 %v2241_v26, %v2313_v29  ;;  %v2325_v37 = vand.u32 4294901760, %v2324_v30  ;;  %v2845_v33 = vand.u32 4294901760, %v2844_v56 }
 0x4b7   :  { %5925 = vmatmul.mubr.f32.vlgmr.msra.gmra.mxu1 %v2323_v24 }
 0x4b8   :  { %5935 = vmatpush3.msra.mxu1 %v2275_v60  ;;  %v2315_v39 = vand.u32 4294901760, %v2314_v36  ;;  %v2326_v45 = vsub.f32 %v2324_v30, %v2325_v37 }
 0x4b9   :  { %5936 = vmatprep.subr.mxu1 %v2278_v63 }
 0x4ba   :  { %5937 = vmatpush3.msra.mxu1 %v2278_v63  ;;  %5938 = vmatprep.mubr.f32.mxu1 %v2315_v39  ;;  %v2316_v46 = vsub.f32 %v2314_v36, %v2315_v39  ;;  %v2327_v52 = vand.u32 4294901760, %v2326_v45 }
 0x4bb   :  { %5948 = vmatprep.subr.mxu1 %v2275_v60  ;;  %5939 = vmatmul.mubr.f32.vlgmr.msra.gmra.mxu1 %v2325_v37 }
 0x4bc   :  { %5949 = vmatpush3.msra.mxu1 %v2275_v60  ;;  %5952 = vmatprep.mubr.f32.mxu1 %v2313_v29  ;;  %v2317_v48 = vand.u32 4294901760, %v2316_v46 }
 0x4bd   :  { %5950 = vmatprep.subr.mxu1 %v2278_v63 }
 0x4be   :  { %5951 = vmatpush3.msra.mxu1 %v2278_v63  ;;  %5917 = vmatprep.mubr.f32.mxu0 %v2317_v48 }
 0x4bf   :  { %5962 = vmatprep.subr.mxu1 %v2894_v51  ;;  %5918 = vmatmul.mubr.f32.vlgmr.msra.gmra.mxu0 %v2327_v52 }
 0x4c0   :  { %5928 = vmatpush3.msra.mxu0 %v6660_v62  ;;  %5953 = vmatmul.mubr.f32.vlgmr.msra.gmra.mxu1 %v2323_v24 }
 0x4c1   :  { %5963 = vmatpush3.xpose.msra.mxu1 %v2894_v51  ;;  %5929 = vmatprep.subr.mxu0 %v6662_v1 }
 0x4c2   :  { %5931 = vmatprep.mubr.f32.mxu0 %v2314_v36  ;;  %5964 = vmatprep.subr.mxu1 %v2901_v54 }
 0x4c3   :  { %5966 = vmatprep.mubr.f32.mxu1 %v6702_v43  ;;  %5930 = vmatpush3.msra.mxu0 %v6662_v1 }
 0x4c4   :  { %5941 = vmatprep.subr.mxu0 %v6665_v4  ;;  %5932 = vmatmul.mubr.f32.vlgmr.msra.gmra.mxu0 %v2324_v30 }
 0x4c5   :  { %5942 = vmatpush3.msra.mxu0 %v6665_v4  ;;  %5965 = vmatpush3.xpose.msra.mxu1 %v2901_v54 }
 0x4c6   :  { %5943 = vmatprep.subr.mxu0 %v6671_v7  ;;  %5945 = vmatprep.mubr.f32.mxu0 %v2313_v29 }
 0x4c7   :  { %5976 = vmatprep.subr.mxu1 %v6677_v14  ;;  %5944 = vmatpush3.msra.mxu0 %v6671_v7 }
 0x4c8   :  { %5955 = vmatprep.subr.mxu0 %v6677_v14  ;;  %5967 = vmatmul.mubr.f32.vlgmr.msra.gmra.mxu1 %v2851_v53 }
 0x4c9   :  { %5946 = vmatmul.mubr.f32.vlgmr.msra.gmra.mxu0 %v2323_v24  ;;  %5977 = vmatpush3.xpose.msra.mxu1 %v6677_v14 }
 0x4ca   :  { %5956 = vmatpush3.xpose.msra.mxu0 %v6677_v14  ;;  %5980 = vmatprep.mubr.f32.mxu1 %v2843_v55 }
 0x4cb   :  { %5957 = vmatprep.subr.mxu0 %v6681_v17  ;;  %5959 = vmatprep.mubr.f32.mxu0 %v2845_v33 }
 0x4cc   :  { %5978 = vmatprep.subr.mxu1 %v6681_v17 }
 0x4cd   :  { %5979 = vmatpush3.xpose.msra.mxu1 %v6681_v17 }
 0x4ce   :  { %5958 = vmatpush3.xpose.msra.mxu0 %v6681_v17  ;;  %5990 = vmatprep.subr.mxu1 %v6677_v14 }
 0x4cf   :  { %5969 = vmatprep.subr.mxu0 %v6684_v18 }
 0x4d0   :  { %5981 = vmatmul.mubr.f32.vlgmr.msra.gmra.mxu1 %v2853_v57 }
 0x4d1   :  { %5960 = vmatmul.mubr.f32.vlgmr.msra.gmra.mxu0 %v2855_v59  ;;  %5991 = vmatpush3.xpose.msra.mxu1 %v6677_v14 }
 0x4d2   :  { %5970 = vmatpush3.xpose.msra.mxu0 %v6684_v18  ;;  %5973 = vmatprep.mubr.f32.mxu0 %v2842_v50 }
 0x4d3   :  { %5994 = vmatprep.mubr.f32.mxu1 %v6702_v43  ;;  %5971 = vmatprep.subr.mxu0 %v6693_v28 }
 0x4d4   :  { %5992 = vmatprep.subr.mxu1 %v6681_v17 }
 0x4d5   :  { %5993 = vmatpush3.xpose.msra.mxu1 %v6681_v17 }
 0x4d6   :  { %5972 = vmatpush3.xpose.msra.mxu0 %v6693_v28 }
 0x4d7   :  { %5983 = vmatprep.subr.mxu0 %v6696_v31 }
 0x4d8   :  { %5995 = vmatmul.mubr.f32.vlgmr.msra.gmra.mxu1 %v2851_v53 }
 0x4d9   :  { %5974 = vmatmul.mubr.f32.vlgmr.msra.gmra.mxu0 %v2852_v32 }
 0x4da   :  { %5984 = vmatpush3.xpose.msra.mxu0 %v6696_v31  ;;  %5987 = vmatprep.mubr.f32.mxu0 %v6702_v43 }
 0x4db   :  { %5985 = vmatprep.subr.mxu0 %v6700_v40 }
 0x4de   :  { %5986 = vmatpush3.xpose.msra.mxu0 %v6700_v40 }
 0x4e1   :  { %5988 = vmatmul.mubr.f32.vlgmr.msra.gmra.mxu0 %v2851_v53 }
 0x577   :  { %v5926_v34 = vpop.f32.mrf.mxu1 }
 0x579   :  { %v2410_v60 = vpop.f32.mrf.mxu1 }
 0x57b   :  { %v5940_v63 = vpop.f32.mrf.mxu1 }
 0x57d   :  { %v2574_v6 = vpop.f32.mrf.mxu1 }
 0x57f   :  { %v5919_v61 = vpop.f32.mrf.mxu0 }
 0x580   :  { %v2417_v62 = vadd.f32 %v5926_v34, %v5919_v61  ;;  %v5954_v12 = vpop.f32.mrf.mxu1 }
 0x581   :  { %v2319_v1 = vpop.f32.mrf.mxu0 }
 0x582   :  { %v2411_v4 = vadd.f32 %v2410_v60, %v2319_v1  ;;  %v2738_v24 = vpop.f32.mrf.mxu1 }
 0x584   :  { %v5933_v5 = vpop.f32.mrf.mxu0 }
 0x585   :  { %v2500_v7 = vadd.f32 %v5933_v5, %v2417_v62 }
 0x586   :  { %v2492_v8 = vpop.f32.mrf.mxu0 }
 0x587   :  { %v2493_v9 = vadd.f32 %v2492_v8, %v2411_v4  ;;  %v2583_v11 = vadd.f32 %v5940_v63, %v2500_v7 }
 0x588   :  { %v5968_v28 = vpop.f32.mrf.mxu1 }
 0x589   :  { %v5947_v13 = vpop.f32.mrf.mxu0  ;;  %v2575_v14 = vadd.f32 %v2574_v6, %v2493_v9 }
 0x58a   :  { %v2666_v15 = vadd.f32 %v5947_v13, %v2583_v11  ;;  %v2938_v35 = vpop.f32.mrf.mxu1 }
 0x58b   :  { %v2659_v17 = vpop.f32.mrf.mxu0 }
 0x58c   :  { %v6740_v18 = vadd.f32 %v5954_v12, %v2666_v15  ;;  %v2660_v20 = vadd.f32 %v2659_v17, %v2575_v14 }
 0x58e   :  { %v6742_v25 = vadd.f32 %v2738_v24, %v2660_v20 }
 0x590   :  { %v5982_v39 = vpop.f32.mrf.mxu1 }
 0x591   :  { %v5961_v26 = vpop.f32.mrf.mxu0 }
 0x592   :  { %v2858_v30 = vadd.f32 %v5961_v26, %v6553_v38  ;;  %v3102_v45 = vpop.f32.mrf.mxu1 }
 0x593   :  { %v2847_v29 = vpop.f32.mrf.mxu0 }
 0x594   :  { %v2848_v31 = vadd.f32 %v2847_v29, %v6555_v41  ;;  %v2945_v37 = vadd.f32 %v5968_v28, %v2858_v30 }
 0x596   :  { %v2939_v43 = vadd.f32 %v2938_v35, %v2848_v31 }
 0x598   :  { %v5996_v47 = vpop.f32.mrf.mxu1 }
 0x599   :  { %v5975_v36 = vpop.f32.mrf.mxu0 }
 0x59a   :  { %v3028_v42 = vadd.f32 %v5975_v36, %v2945_v37  ;;  %v3266_v38 = vpop.f32.mrf.mxu1 }
 0x59b   :  { %v3020_v40 = vpop.f32.mrf.mxu0 }
 0x59c   :  { %v3021_v44 = vadd.f32 %v3020_v40, %v2939_v43  ;;  %v3111_v46 = vadd.f32 %v5982_v39, %v3028_v42 }
 0x59e   :  { %v3103_v50 = vadd.f32 %v3102_v45, %v3021_v44 }
 0x5a1   :  { %v5989_v48 = vpop.f32.mrf.mxu0 }
 0x5a2   :  { %v3194_v49 = vadd.f32 %v5989_v48, %v3111_v46 }
 0x5a3   :  { %v3187_v51 = vpop.f32.mrf.mxu0 }
 0x5a4   :  { %v3188_v52 = vadd.f32 %v3187_v51, %v3103_v50  ;;  %v3273_v53 = vadd.f32 %v5996_v47, %v3194_v49 }
 0x5a6   :  { %v3279_v41 = vsel %vm1167_vm2, %v3273_v53, -inf  ;;  %v3267_v54 = vadd.f32 %v3266_v38, %v3188_v52 }
 0x5a7   :  { %3280 = vmax.xlane.f32.xlu0 %v3279_v41 }
 0x5a8   :  { %v3276_v55 = vsel %vm1167_vm2, %v3267_v54, -inf }
 0x5a9   :  { %3277 = vmax.xlane.f32.xlu1 %v3276_v55 }
 0x5ba   :  { %3288 = vrot.lane.b32.xlu1 %v6513_v2, %s6386_s29 }
 0x5bd   :  { %3290 = vrot.lane.b32.xlu0 %v6511_v0, %s6386_s29 }
 0x5be   :  { %3818 = vrot.lane.b32.xlu1 %v6511_v0, %s6387_s30 }
 0x5c1   :  { %3816 = vrot.lane.b32.xlu0 %v6513_v2, %s6387_s30 }
 0x5c2   :  { %3812 = vrot.lane.b32.xlu1 %v6517_v3, %s6388_s7 }
 0x5c5   :  { %3814 = vrot.lane.b32.xlu0 %v6532_v10, %s6388_s7 }
 0x630   :  { %v3281_v32 = vpop.xlane.xlu0 %3280 }
 0x631   :  { %v3283_v56 = vsub.f32 %v3273_v53, %v3281_v32 }
 0x632   :  { %v3278_v57 = vpop.xlane.xlu1 %3277 }
 0x633   :  { %v3286_v33 = vmul.f32 1.442695, %v3283_v56  ;;  %v3282_v58 = vsub.f32 %v3267_v54, %v3278_v57 }
 0x634   :  { %v3291_v59 = vpop.permute.xlu0 %3290 }
 0x635   :  { %6218 = vpow2.f32 %v3286_v33  ;;  %v3284_v34 = vmul.f32 1.442695, %v3282_v58  ;;  %v3329_v60 = vand.u32 4294901760, %v3291_v59 }
 0x636   :  { %v3289_v61 = vpop.permute.xlu1 %3288 }
 0x637   :  { %6220 = vpow2.f32 %v3284_v34  ;;  %v6754_v62 = vsub.f32 %v3291_v59, %v3329_v60  ;;  %v3332_v63 = vand.u32 4294901760, %v3289_v61  ;;  %5997 = vmatprep.subr.mxu0 %v3329_v60 }
 0x638   :  { %5998 = vmatpush3.msra.mxu0 %v3329_v60  ;;  %v3817_v6 = vpop.permute.xlu0 %3816 }
 0x639   :  { %v6756_v1 = vsub.f32 %v3289_v61, %v3332_v63  ;;  %5999 = vmatprep.subr.mxu0 %v3332_v63  ;;  %v6759_v3 = vand.u32 4294901760, %v6754_v62  ;;  %v3824_v11 = vsel %vm654_vm1, %v3817_v6, 0 }
 0x63a   :  { %6000 = vmatpush3.msra.mxu0 %v3332_v63  ;;  %v3819_v10 = vpop.permute.xlu1 %3818  ;;  %v6775_v15 = vand.u32 4294901760, %v3824_v11 }
 0x63b   :  { %6011 = vmatprep.subr.mxu0 %v6754_v62  ;;  %v3419_v4 = vsub.f32 %v6754_v62, %v6759_v3  ;;  %v6765_v5 = vand.u32 4294901760, %v6756_v1  ;;  %v3826_v7 = vsel %vm654_vm1, %v3819_v10, 0 }
 0x63c   :  { %v6771_v12 = vand.u32 4294901760, %v3826_v7  ;;  %v6787_v30 = vsub.f32 %v3824_v11, %v6775_v15  ;;  %v3815_v44 = vpop.permute.xlu0 %3814 }
 0x63d   :  { %v3420_v8 = vand.u32 4294901760, %v3419_v4  ;;  %v3426_v9 = vsub.f32 %v6756_v1, %v6765_v5  ;;  %v3822_v49 = vsel %vm654_vm1, %v3815_v44, 0 }
 0x63e   :  { %v6778_v17 = vsub.f32 %v3826_v7, %v6771_v12  ;;  %v3813_v28 = vpop.permute.xlu1 %3812  ;;  %v6794_v43 = vand.u32 4294901760, %v6787_v30  ;;  %v3905_v41 = vand.u32 4294901760, %v3822_v49 }
 0x63f   :  { %6004 = vmatprep.subr.mxu1 %v3420_v8  ;;  %v3427_v13 = vand.u32 4294901760, %v3426_v9  ;;  %v3820_v37 = vsel %vm654_vm1, %v3813_v28, 0 }
 0x640   :  { %6005 = vmatpush3.msra.mxu1 %v3420_v8  ;;  %v6790_v36 = vand.u32 4294901760, %v6778_v17  ;;  %v6796_v45 = vand.u32 4294901760, %v3820_v37  ;;  %v3954_v51 = vsub.f32 %v6787_v30, %v6794_v43  ;;  %v3906_v32 = vsub.f32 %v3822_v49, %v3905_v41 }
 0x641   :  { %6006 = vmatprep.subr.mxu1 %v3427_v13 }
 0x642   :  { %v6773_v14 = vpop.eup %6218  ;;  %6007 = vmatpush3.msra.mxu1 %v3427_v13  ;;  %v3947_v46 = vsub.f32 %v6778_v17, %v6790_v36  ;;  %v3896_v52 = vsub.f32 %v3820_v37, %v6796_v45  ;;  %v3955_v54 = vand.u32 4294901760, %v3954_v51  ;;  %v3907_v57 = vand.u32 4294901760, %v3906_v32  ;;  %v6243_v37 = vld [vmem:[#allocation10] sm:$0xff] }
 0x643   :  { %6018 = vmatprep.subr.mxu1 %v3329_v60  ;;  %v3298_v20 = vsel %vm1167_vm2, %v6773_v14, 0 }
 0x644   :  { %v6782_v24 = vpop.eup %6220  ;;  %v3377_v26 = vand.u32 4294901760, %v3298_v20  ;;  %v3948_v53 = vand.u32 4294901760, %v3947_v46  ;;  %v3897_v55 = vand.u32 4294901760, %v3896_v52  ;;  %v3908_v58 = vsub.f32 %v3906_v32, %v3907_v57 }
 0x645   :  { %v3295_v29 = vsel %vm1167_vm2, %v6782_v24, 0 }
 0x646   :  { %v3367_v31 = vand.u32 4294901760, %v3295_v29  ;;  %v3378_v35 = vsub.f32 %v3298_v20, %v3377_v26  ;;  %v3898_v56 = vsub.f32 %v3896_v52, %v3897_v55  ;;  %v3909_v59 = vand.u32 4294901760, %v3908_v58 }
 0x647   :  { %v2751_v58 = vsel %vm1167_vm2, %v6679_v16, 0.0 }
 0x648   :  { %6008 = vmatprep.mubr.f32.mxu1 %v3367_v31  ;;  %v3368_v39 = vsub.f32 %v3295_v29, %v3367_v31  ;;  %v3379_v40 = vand.u32 4294901760, %v3378_v35  ;;  %v3899_v33 = vand.u32 4294901760, %v3898_v56 }
 0x649   :  { %6009 = vmatmul.mubr.f32.vlgmr.msra.gmra.mxu1 %v3377_v26 }
 0x64a   :  { %6019 = vmatpush3.msra.mxu1 %v3329_v60  ;;  %v3369_v42 = vand.u32 4294901760, %v3368_v39  ;;  %v3380_v47 = vsub.f32 %v3378_v35, %v3379_v40 }
 0x64b   :  { %6020 = vmatprep.subr.mxu1 %v3332_v63 }
 0x64c   :  { %6021 = vmatpush3.msra.mxu1 %v3332_v63  ;;  %6022 = vmatprep.mubr.f32.mxu1 %v3369_v42  ;;  %v3370_v48 = vsub.f32 %v3368_v39, %v3369_v42  ;;  %v3381_v38 = vand.u32 4294901760, %v3380_v47 }
 0x64d   :  { %6032 = vmatprep.subr.mxu1 %v3329_v60  ;;  %6023 = vmatmul.mubr.f32.vlgmr.msra.gmra.mxu1 %v3379_v40 }
 0x64e   :  { %6033 = vmatpush3.msra.mxu1 %v3329_v60  ;;  %6036 = vmatprep.mubr.f32.mxu1 %v3367_v31  ;;  %v3371_v50 = vand.u32 4294901760, %v3370_v48 }
 0x64f   :  { %6034 = vmatprep.subr.mxu1 %v3332_v63 }
 0x650   :  { %6035 = vmatpush3.msra.mxu1 %v3332_v63  ;;  %6001 = vmatprep.mubr.f32.mxu0 %v3371_v50 }
 0x651   :  { %6046 = vmatprep.subr.mxu1 %v3948_v53  ;;  %6002 = vmatmul.mubr.f32.vlgmr.msra.gmra.mxu0 %v3381_v38 }
 0x652   :  { %6012 = vmatpush3.msra.mxu0 %v6754_v62  ;;  %6037 = vmatmul.mubr.f32.vlgmr.msra.gmra.mxu1 %v3377_v26 }
 0x653   :  { %6047 = vmatpush3.xpose.msra.mxu1 %v3948_v53  ;;  %6013 = vmatprep.subr.mxu0 %v6756_v1 }
 0x654   :  { %6015 = vmatprep.mubr.f32.mxu0 %v3368_v39  ;;  %6048 = vmatprep.subr.mxu1 %v3955_v54 }
 0x655   :  { %6050 = vmatprep.mubr.f32.mxu1 %v6796_v45  ;;  %6014 = vmatpush3.msra.mxu0 %v6756_v1 }
 0x656   :  { %6025 = vmatprep.subr.mxu0 %v6759_v3  ;;  %6016 = vmatmul.mubr.f32.vlgmr.msra.gmra.mxu0 %v3378_v35  ;;  %v6242_v35 = vld [vmem:[#allocation10 + $0x8] sm:$0xff] }
 0x657   :  { %6026 = vmatpush3.msra.mxu0 %v6759_v3  ;;  %6049 = vmatpush3.xpose.msra.mxu1 %v3955_v54 }
 0x658   :  { %6027 = vmatprep.subr.mxu0 %v6765_v5  ;;  %6029 = vmatprep.mubr.f32.mxu0 %v3367_v31 }
 0x659   :  { %6060 = vmatprep.subr.mxu1 %v6771_v12  ;;  %6028 = vmatpush3.msra.mxu0 %v6765_v5 }
 0x65a   :  { %6039 = vmatprep.subr.mxu0 %v6771_v12  ;;  %6051 = vmatmul.mubr.f32.vlgmr.msra.gmra.mxu1 %v3905_v41 }
 0x65b   :  { %6030 = vmatmul.mubr.f32.vlgmr.msra.gmra.mxu0 %v3377_v26  ;;  %6061 = vmatpush3.xpose.msra.mxu1 %v6771_v12 }
 0x65c   :  { %6040 = vmatpush3.xpose.msra.mxu0 %v6771_v12  ;;  %6064 = vmatprep.mubr.f32.mxu1 %v3897_v55 }
 0x65d   :  { %6041 = vmatprep.subr.mxu0 %v6775_v15  ;;  %6043 = vmatprep.mubr.f32.mxu0 %v3899_v33 }
 0x65e   :  { %6062 = vmatprep.subr.mxu1 %v6775_v15 }
 0x65f   :  { %6063 = vmatpush3.xpose.msra.mxu1 %v6775_v15 }
 0x660   :  { %6042 = vmatpush3.xpose.msra.mxu0 %v6775_v15  ;;  %6074 = vmatprep.subr.mxu1 %v6771_v12 }
 0x661   :  { %6053 = vmatprep.subr.mxu0 %v6778_v17 }
 0x662   :  { %6065 = vmatmul.mubr.f32.vlgmr.msra.gmra.mxu1 %v3907_v57 }
 0x663   :  { %6044 = vmatmul.mubr.f32.vlgmr.msra.gmra.mxu0 %v3909_v59  ;;  %6075 = vmatpush3.xpose.msra.mxu1 %v6771_v12  ;;  %v2748_v59 = vsel %vm1167_vm2, %v6688_v21, 0.0 }
 0x664   :  { %6054 = vmatpush3.xpose.msra.mxu0 %v6778_v17  ;;  %6057 = vmatprep.mubr.f32.mxu0 %v3896_v52 }
 0x665   :  { %6078 = vmatprep.mubr.f32.mxu1 %v6796_v45  ;;  %6055 = vmatprep.subr.mxu0 %v6787_v30 }
 0x666   :  { %6076 = vmatprep.subr.mxu1 %v6775_v15 }
 0x667   :  { %6077 = vmatpush3.xpose.msra.mxu1 %v6775_v15 }
 0x668   :  { %6056 = vmatpush3.xpose.msra.mxu0 %v6787_v30 }
 0x669   :  { %6067 = vmatprep.subr.mxu0 %v6790_v36 }
 0x66a   :  { %6079 = vmatmul.mubr.f32.vlgmr.msra.gmra.mxu1 %v3905_v41 }
 0x66b   :  { %6058 = vmatmul.mubr.f32.vlgmr.msra.gmra.mxu0 %v3906_v32 }
 0x66c   :  { %6068 = vmatpush3.xpose.msra.mxu0 %v6790_v36  ;;  %6071 = vmatprep.mubr.f32.mxu0 %v6796_v45 }
 0x66d   :  { %6069 = vmatprep.subr.mxu0 %v6794_v43 }
 0x670   :  { %6070 = vmatpush3.xpose.msra.mxu0 %v6794_v43 }
 0x673   :  { %6072 = vmatmul.mubr.f32.vlgmr.msra.gmra.mxu0 %v3905_v41 }
 0x709   :  { %v6010_v34 = vpop.f32.mrf.mxu1 }
 0x70b   :  { %v3464_v60 = vpop.f32.mrf.mxu1 }
 0x70d   :  { %v6024_v63 = vpop.f32.mrf.mxu1 }
 0x70f   :  { %v3628_v4 = vpop.f32.mrf.mxu1 }
 0x711   :  { %v6003_v61 = vpop.f32.mrf.mxu0 }
 0x712   :  { %v3471_v62 = vadd.f32 %v6010_v34, %v6003_v61  ;;  %v6038_v9 = vpop.f32.mrf.mxu1  ;;  %v3802_v34 = vsel %vm1167_vm2, %v6782_v24, 0.0 }
 0x713   :  { %v3373_v1 = vpop.f32.mrf.mxu0 }
 0x714   :  { %v3465_v3 = vadd.f32 %v3464_v60, %v3373_v1  ;;  %v3792_v26 = vpop.f32.mrf.mxu1  ;;  %v3805_v60 = vsel %vm1167_vm2, %v6773_v14, 0.0 }
 0x716   :  { %v6017_v10 = vpop.f32.mrf.mxu0 }
 0x717   :  { %v3554_v5 = vadd.f32 %v6017_v10, %v3471_v62 }
 0x718   :  { %v3546_v6 = vpop.f32.mrf.mxu0 }
 0x719   :  { %v3547_v7 = vadd.f32 %v3546_v6, %v3465_v3  ;;  %v3637_v8 = vadd.f32 %v6024_v63, %v3554_v5 }
 0x71a   :  { %v6052_v30 = vpop.f32.mrf.mxu1 }
 0x71b   :  { %v6031_v11 = vpop.f32.mrf.mxu0  ;;  %v3629_v12 = vadd.f32 %v3628_v4, %v3547_v7 }
 0x71c   :  { %v3720_v13 = vadd.f32 %v6031_v11, %v3637_v8  ;;  %v3992_v40 = vpop.f32.mrf.mxu1 }
 0x71d   :  { %v3713_v15 = vpop.f32.mrf.mxu0 }
 0x71e   :  { %v6834_v17 = vadd.f32 %v6038_v9, %v3720_v13  ;;  %v3714_v20 = vadd.f32 %v3713_v15, %v3629_v12 }
 0x720   :  { %v6836_v28 = vadd.f32 %v3792_v26, %v3714_v20 }
 0x722   :  { %v6066_v44 = vpop.f32.mrf.mxu1 }
 0x723   :  { %v6045_v29 = vpop.f32.mrf.mxu0 }
 0x724   :  { %v3912_v36 = vadd.f32 %v6242_v35, %v6045_v29  ;;  %v4156_v49 = vpop.f32.mrf.mxu1  ;;  %v1697_v35 = vsel %vm1167_vm2, %v6575_v22, 0.0 }
 0x725   :  { %v3901_v31 = vpop.f32.mrf.mxu0 }
 0x726   :  { %v3902_v39 = vadd.f32 %v6243_v37, %v3901_v31  ;;  %v3999_v43 = vadd.f32 %v6052_v30, %v3912_v36 }
 0x728   :  { %v3993_v47 = vadd.f32 %v3992_v40, %v3902_v39  ;;  %v1694_v39 = vsel %vm1167_vm2, %v6587_v27, 0.0 }
 0x72a   :  { %v6080_v51 = vpop.f32.mrf.mxu1 }
 0x72b   :  { %v6059_v42 = vpop.f32.mrf.mxu0 }
 0x72c   :  { %v4082_v46 = vadd.f32 %v6059_v42, %v3999_v43  ;;  %v4320_v32 = vpop.f32.mrf.mxu1 }
 0x72d   :  { %v4074_v45 = vpop.f32.mrf.mxu0 }
 0x72e   :  { %v4075_v48 = vadd.f32 %v4074_v45, %v3993_v47  ;;  %v4165_v50 = vadd.f32 %v6066_v44, %v4082_v46 }
 0x730   :  { %v4157_v38 = vadd.f32 %v4156_v49, %v4075_v48 }
 0x733   :  { %v6073_v52 = vpop.f32.mrf.mxu0 }
 0x734   :  { %v4248_v53 = vadd.f32 %v6073_v52, %v4165_v50 }
 0x735   :  { %v4241_v41 = vpop.f32.mrf.mxu0 }
 0x736   :  { %v4242_v54 = vadd.f32 %v4241_v41, %v4157_v38  ;;  %v4327_v55 = vadd.f32 %v6080_v51, %v4248_v53 }
 0x738   :  { %v4333_v56 = vsel %vm1167_vm2, %v4327_v55, -inf  ;;  %v4321_v57 = vadd.f32 %v4320_v32, %v4242_v54  ;;  %v4900_v54 = vld [vmem:[#allocation8 + $0x18] sm:$0xff] }
 0x739   :  { %4334 = vmax.xlane.f32.xlu0 %v4333_v56  ;;  %v4899_v56 = vld [vmem:[#allocation8 + $0x10] sm:$0xff] }
 0x73a   :  { %v4330_v33 = vsel %vm1167_vm2, %v4321_v57, -inf }
 0x73b   :  { %4331 = vmax.xlane.f32.xlu1 %v4330_v33  ;;  %v4898_v33 = vld [vmem:[#allocation8 + $0x8] sm:$0xff] }
 0x74c   :  { %4342 = vrot.lane.b32.xlu1 %v6513_v2, %s6389_s8 }
 0x74f   :  { %4344 = vrot.lane.b32.xlu0 %v6511_v0, %s6389_s8 }
 0x76e   :  { %2752 = vadd.xlane.f32.xlu0 %v2751_v58 }
 0x770   :  { %2749 = vadd.xlane.f32.xlu1 %v2748_v59  ;;  %v6881_v59 = vand.u32 4294901760, %v4898_v33 }
 0x772   :  { %3803 = vadd.xlane.f32.xlu0 %v3802_v34 }
 0x774   :  { %3806 = vadd.xlane.f32.xlu1 %v3805_v60 }
 0x7c2   :  { %v4335_v61 = vpop.xlane.xlu0 %4334 }
 0x7c3   :  { %v4337_v2 = vsub.f32 %v4327_v55, %v4335_v61  ;;  %v6864_v55 = vand.u32 4294901760, %v4900_v54  ;;  %v4897_v61 = vld [vmem:[#allocation8] sm:$0xff] }
 0x7c4   :  { %v4332_v62 = vpop.xlane.xlu1 %4331 }
 0x7c5   :  { %v4340_v0 = vmul.f32 1.442695, %v4337_v2  ;;  %v4336_v63 = vsub.f32 %v4321_v57, %v4332_v62  ;;  %v6876_v57 = vand.u32 4294901760, %v4899_v56  ;;  %v6889_v62 = vsub.f32 %v4898_v33, %v6881_v59 }
 0x7c6   :  { %v4345_v1 = vpop.permute.xlu0 %4344 }
 0x7c7   :  { %6222 = vpow2.f32 %v4340_v0  ;;  %v4338_v16 = vmul.f32 1.442695, %v4336_v63  ;;  %v4383_v3 = vand.u32 4294901760, %v4345_v1  ;;  %v6879_v58 = vsub.f32 %v4899_v56, %v6876_v57 }
 0x7c8   :  { %v4343_v10 = vpop.permute.xlu1 %4342  ;;  %v6891_v0 = vand.u32 4294901760, %v4897_v61 }
 0x7c9   :  { %6224 = vpow2.f32 %v4338_v16  ;;  %v4471_v21 = vsub.f32 %v4345_v1, %v4383_v3  ;;  %v4386_v4 = vand.u32 4294901760, %v4343_v10  ;;  %6081 = vmatprep.subr.mxu0 %v4383_v3  ;;  %v6886_v2 = vand.u32 4294901760, %v6879_v58 }
 0x7ca   :  { %6082 = vmatpush3.msra.mxu0 %v4383_v3  ;;  %v6898_v16 = vand.u32 4294901760, %v6889_v62 }
 0x7cb   :  { %v4478_v24 = vsub.f32 %v4343_v10, %v4386_v4  ;;  %6083 = vmatprep.subr.mxu0 %v4386_v4  ;;  %v4472_v5 = vand.u32 4294901760, %v4471_v21  ;;  %v5031_v1 = vsub.f32 %v6879_v58, %v6886_v2 }
 0x7cc   :  { %6084 = vmatpush3.msra.mxu0 %v4386_v4 }
 0x7cd   :  { %6095 = vmatprep.subr.mxu0 %v4471_v21  ;;  %v4473_v14 = vsub.f32 %v4471_v21, %v4472_v5  ;;  %v4479_v6 = vand.u32 4294901760, %v4478_v24 }
 0x7cf   :  { %v4474_v7 = vand.u32 4294901760, %v4473_v14  ;;  %v4480_v8 = vsub.f32 %v4478_v24, %v4479_v6 }
 0x7d1   :  { %6088 = vmatprep.subr.mxu1 %v4474_v7  ;;  %v4481_v9 = vand.u32 4294901760, %v4480_v8 }
 0x7d2   :  { %6089 = vmatpush3.msra.mxu1 %v4474_v7 }
 0x7d3   :  { %6090 = vmatprep.subr.mxu1 %v4481_v9 }
 0x7d4   :  { %v6223_v11 = vpop.eup %6222  ;;  %6091 = vmatpush3.msra.mxu1 %v4481_v9 }
 0x7d5   :  { %6102 = vmatprep.subr.mxu1 %v4383_v3  ;;  %v4859_v12 = vsel %vm1167_vm2, %v6223_v11, 0.0  ;;  %v4352_v13 = vsel %vm1167_vm2, %v6223_v11, 0 }
 0x7d6   :  { %v6225_v15 = vpop.eup %6224  ;;  %4860 = vadd.xlane.f32.xlu1 %v4859_v12  ;;  %v4431_v20 = vand.u32 4294901760, %v4352_v13 }
 0x7d7   :  { %v4856_v26 = vsel %vm1167_vm2, %v6225_v15, 0.0  ;;  %v4349_v29 = vsel %vm1167_vm2, %v6225_v15, 0 }
 0x7d8   :  { %4857 = vadd.xlane.f32.xlu0 %v4856_v26  ;;  %v4421_v30 = vand.u32 4294901760, %v4349_v29  ;;  %v4432_v31 = vsub.f32 %v4352_v13, %v4431_v20 }
 0x7da   :  { %1698 = vadd.xlane.f32.xlu1 %v1697_v35  ;;  %6092 = vmatprep.mubr.f32.mxu1 %v4421_v30  ;;  %v4422_v36 = vsub.f32 %v4349_v29, %v4421_v30  ;;  %v4433_v37 = vand.u32 4294901760, %v4432_v31 }
 0x7db   :  { %6093 = vmatmul.mubr.f32.vlgmr.msra.gmra.mxu1 %v4431_v20 }
 0x7dc   :  { %6103 = vmatpush3.msra.mxu1 %v4383_v3  ;;  %1695 = vadd.xlane.f32.xlu0 %v1694_v39  ;;  %v4423_v40 = vand.u32 4294901760, %v4422_v36  ;;  %v4434_v42 = vsub.f32 %v4432_v31, %v4433_v37 }
 0x7dd   :  { %6104 = vmatprep.subr.mxu1 %v4386_v4 }
 0x7de   :  { %6105 = vmatpush3.msra.mxu1 %v4386_v4  ;;  %6106 = vmatprep.mubr.f32.mxu1 %v4423_v40  ;;  %v4424_v43 = vsub.f32 %v4422_v36, %v4423_v40  ;;  %v4435_v44 = vand.u32 4294901760, %v4434_v42 }
 0x7df   :  { %6116 = vmatprep.subr.mxu1 %v4383_v3  ;;  %6107 = vmatmul.mubr.f32.vlgmr.msra.gmra.mxu1 %v4433_v37 }
 0x7e0   :  { %6117 = vmatpush3.msra.mxu1 %v4383_v3  ;;  %6120 = vmatprep.mubr.f32.mxu1 %v4421_v30  ;;  %v4425_v22 = vand.u32 4294901760, %v4424_v43  ;;  %v6901_v3 = vsub.f32 %v4897_v61, %v6891_v0 }
 0x7e1   :  { %6118 = vmatprep.subr.mxu1 %v4386_v4 }
 0x7e2   :  { %6119 = vmatpush3.msra.mxu1 %v4386_v4  ;;  %6085 = vmatprep.mubr.f32.mxu0 %v4425_v22  ;;  %v5032_v4 = vand.u32 4294901760, %v5031_v1 }
 0x7e3   :  { %6086 = vmatmul.mubr.f32.vlgmr.msra.gmra.mxu0 %v4435_v44  ;;  %6121 = vmatmul.mubr.f32.vlgmr.msra.gmra.mxu1 %v4431_v20 }
 0x7e4   :  { %6096 = vmatpush3.msra.mxu0 %v4471_v21  ;;  %6099 = vmatprep.mubr.f32.mxu0 %v4422_v36 }
 0x7e5   :  { %6097 = vmatprep.subr.mxu0 %v4478_v24 }
 0x7e6   :  { %6098 = vmatpush3.msra.mxu0 %v4478_v24  ;;  %v5038_v24 = vsub.f32 %v6889_v62, %v6898_v16 }
 0x7e7   :  { %6109 = vmatprep.subr.mxu0 %v4472_v5  ;;  %6100 = vmatmul.mubr.f32.vlgmr.msra.gmra.mxu0 %v4432_v31 }
 0x7e8   :  { %6110 = vmatpush3.msra.mxu0 %v4472_v5  ;;  %6113 = vmatprep.mubr.f32.mxu0 %v4421_v30  ;;  %v6908_v5 = vand.u32 4294901760, %v6901_v3  ;;  %v5039_v7 = vand.u32 4294901760, %v5038_v24 }
 0x7e9   :  { %6111 = vmatprep.subr.mxu0 %v4479_v6 }
 0x7ea   :  { %6112 = vmatpush3.msra.mxu0 %v4479_v6  ;;  %v5045_v8 = vsub.f32 %v6901_v3, %v6908_v5 }
 0x7eb   :  { %6114 = vmatmul.mubr.f32.vlgmr.msra.gmra.mxu0 %v4431_v20  ;;  %6123 = vmatprep.subr.mxu0 %v6864_v55 }
 0x7ec   :  { %6124 = vmatpush3.msra.mxu0 %v6864_v55  ;;  %v5046_v15 = vand.u32 4294901760, %v5045_v8 }
 0x7ed   :  { %6125 = vmatprep.subr.mxu0 %v6876_v57 }
 0x7ee   :  { %6126 = vmatpush3.msra.mxu0 %v6876_v57 }
 0x7ef   :  { %6127 = vmatprep.subr.mxu0 %v6881_v59 }
 0x7f0   :  { %6128 = vmatpush3.msra.mxu0 %v6881_v59 }
 0x7f1   :  { %6129 = vmatprep.subr.mxu0 %v6891_v0 }
 0x7f2   :  { %6130 = vmatpush3.msra.mxu0 %v6891_v0 }
 0x7f7   :  { %v2753_v27 = vpop.xlane.xlu0 %2752 }
 0x7f8   :  { %6226 = vrcp.f32 %v2753_v27 }
 0x7f9   :  { %v2750_v45 = vpop.xlane.xlu1 %2749 }
 0x7fa   :  { %6228 = vrcp.f32 %v2750_v45 }
 0x7fb   :  { %v3804_v46 = vpop.xlane.xlu0 %3803 }
 0x7fc   :  { %6230 = vrcp.f32 %v3804_v46 }
 0x7fd   :  { %v3807_v47 = vpop.xlane.xlu1 %3806 }
 0x7fe   :  { %6232 = vrcp.f32 %v3807_v47 }
 0x805   :  { %v6227_v48 = vpop.eup %6226 }
 0x806   :  { %v2757_v49 = vmul.f32 %v6227_v48, %v6740_v18  ;;  %v6867_v18 = vsub.f32 %v4900_v54, %v6864_v55 }
 0x807   :  { %v6229_v50 = vpop.eup %6228 }
 0x808   :  { %4870 = vrot.lane.b32.xlu1 %v2757_v49, %s6375_s27  ;;  %v2755_v51 = vmul.f32 %v6229_v50, %v6742_v25  ;;  %v6872_v25 = vand.u32 4294901760, %v6867_v18  ;;  %6145 = vmatprep.subr.mxu0 %v6867_v18 }
 0x809   :  { %v6231_v52 = vpop.eup %6230 }
 0x80a   :  { %4868 = vrot.lane.b32.xlu0 %v2755_v51, %s6375_s27  ;;  %v3809_v53 = vmul.f32 %v6231_v52, %v6836_v28  ;;  %v5024_v28 = vsub.f32 %v6867_v18, %v6872_v25 }
 0x80b   :  { %v6233_v38 = vpop.eup %6232 }
 0x80c   :  { %4876 = vrot.lane.b32.xlu1 %v3809_v53, %s6390_s9  ;;  %v3811_v41 = vmul.f32 %v6233_v38, %v6834_v17  ;;  %v5025_v32 = vand.u32 4294901760, %v5024_v28 }
 0x80e   :  { %4878 = vrot.lane.b32.xlu0 %v3811_v41, %s6390_s9  ;;  %6134 = vmatprep.subr.mxu1 %v5025_v32 }
 0x80f   :  { %6135 = vmatpush3.msra.mxu1 %v5025_v32 }
 0x810   :  { %6136 = vmatprep.subr.mxu1 %v5032_v4 }
 0x811   :  { %6137 = vmatpush3.msra.mxu1 %v5032_v4 }
 0x812   :  { %6138 = vmatprep.subr.mxu1 %v5039_v7 }
 0x813   :  { %6139 = vmatpush3.msra.mxu1 %v5039_v7 }
 0x814   :  { %6140 = vmatprep.subr.mxu1 %v5046_v15 }
 0x815   :  { %6141 = vmatpush3.msra.mxu1 %v5046_v15 }
 0x816   :  { %6156 = vmatprep.subr.mxu1 %v6864_v55 }
 0x85f   :  { %v4861_v34 = vpop.xlane.xlu1 %4860 }
 0x860   :  { %6234 = vrcp.f32 %v4861_v34 }
 0x861   :  { %v4858_v63 = vpop.xlane.xlu0 %4857 }
 0x862   :  { %6236 = vrcp.f32 %v4858_v63 }
 0x863   :  { %v1699_v46 = vpop.xlane.xlu1 %1698 }
 0x864   :  { %6238 = vrcp.f32 %v1699_v46 }
 0x865   :  { %v1696_v47 = vpop.xlane.xlu0 %1695 }
 0x866   :  { %6240 = vrcp.f32 %v1696_v47 }
 0x86d   :  { %v6235_v42 = vpop.eup %6234 }
 0x86f   :  { %v6237_v27 = vpop.eup %6236 }
 0x871   :  { %v6239_v50 = vpop.eup %6238 }
 0x872   :  { %v1703_v53 = vmul.f32 %v6239_v50, %v6646_v19 }
 0x873   :  { %v6241_v51 = vpop.eup %6240 }
 0x874   :  { %v1701_v38 = vmul.f32 %v6241_v51, %v6648_v23 }
 0x87a   :  { %v4871_v49 = vpop.permute.xlu1 %4870 }
 0x87b   :  { %v4891_v54 = vsel %vm654_vm1, %v1703_v53, %v4871_v49 }
 0x87c   :  { %v4869_v48 = vpop.permute.xlu0 %4868 }
 0x87d   :  { %v4890_v28 = vsel %vm654_vm1, %v1701_v38, %v4869_v48 }
 0x87e   :  { %v4877_v41 = vpop.permute.xlu1 %4876 }
 0x87f   :  { %v4892_v33 = vsel %vm1167_vm2, %v4890_v28, %v4877_v41 }
 0x880   :  { %v4879_v52 = vpop.permute.xlu0 %4878 }
 0x881   :  { %v4893_v32 = vsel %vm1167_vm2, %v4891_v54, %v4879_v52 }
 0x89b   :  { %v6094_v17 = vpop.f32.mrf.mxu1 }
 0x89d   :  { %v4518_v60 = vpop.f32.mrf.mxu1 }
 0x89f   :  { %v6108_v10 = vpop.f32.mrf.mxu1 }
 0x8a1   :  { %v4682_v9 = vpop.f32.mrf.mxu1 }
 0x8a3   :  { %v6087_v21 = vpop.f32.mrf.mxu0  ;;  %v6122_v30 = vpop.f32.mrf.mxu1 }
 0x8a4   :  { %v4525_v6 = vadd.f32 %v6094_v17, %v6087_v21 }
 0x8a5   :  { %v4427_v14 = vpop.f32.mrf.mxu0  ;;  %v4846_v43 = vpop.f32.mrf.mxu1 }
 0x8a6   :  { %v4519_v12 = vadd.f32 %v4518_v60, %v4427_v14 }
 0x8a7   :  { %v6101_v11 = vpop.f32.mrf.mxu0 }
 0x8a8   :  { %v4608_v13 = vadd.f32 %v6101_v11, %v4525_v6 }
 0x8a9   :  { %v4600_v20 = vpop.f32.mrf.mxu0 }
 0x8aa   :  { %v4601_v26 = vadd.f32 %v4600_v20, %v4519_v12  ;;  %v4691_v29 = vadd.f32 %v6108_v10, %v4608_v13 }
 0x8ab   :  { %v6115_v31 = vpop.f32.mrf.mxu0 }
 0x8ac   :  { %v4774_v35 = vadd.f32 %v6115_v31, %v4691_v29  ;;  %v4683_v36 = vadd.f32 %v4682_v9, %v4601_v26 }
 0x8ad   :  { %v4767_v37 = vpop.f32.mrf.mxu0 }
 0x8ae   :  { %v4853_v39 = vadd.f32 %v6122_v30, %v4774_v35  ;;  %v4768_v40 = vadd.f32 %v4767_v37, %v4683_v36 }
 0x8b0   :  { %v4847_v22 = vadd.f32 %v4846_v43, %v4768_v40  ;;  %v4865_v44 = vmul.f32 %v6235_v42, %v4853_v39 }
 0x8b2   :  { %4886 = vrot.lane.b32.xlu0 %v4865_v44, %s6391_s10  ;;  %v4863_v45 = vmul.f32 %v6237_v27, %v4847_v22 }
 0x8b4   :  { %4884 = vrot.lane.b32.xlu1 %v4863_v45, %s6391_s10 }
 0x924   :  { %v4887_v17 = vpop.permute.xlu0 %4886 }
 0x925   :  { %v4896_v56 = vsel %vm4894_vm3, %v4893_v32, %v4887_v17 }
 0x926   :  { %v4905_v34 = vsel %vm109_vm0, %v4896_v56, 0  ;;  %v4885_v60 = vpop.permute.xlu1 %4884 }
 0x927   :  { %v4986_v61 = vand.u32 4294901760, %v4905_v34  ;;  %v4895_v63 = vsel %vm4894_vm3, %v4892_v33, %v4885_v60 }
 0x928   :  { %v4902_v19 = vsel %vm109_vm0, %v4895_v63, 0 }
 0x929   :  { %v4987_v23 = vsub.f32 %v4905_v34, %v4986_v61  ;;  %v4976_v1 = vand.u32 4294901760, %v4902_v19 }
 0x92b   :  { %v4977_v10 = vsub.f32 %v4902_v19, %v4976_v1  ;;  %6142 = vmatprep.mubr.f32.mxu1 %v4976_v1  ;;  %v4988_v21 = vand.u32 4294901760, %v4987_v23 }
 0x92c   :  { %6143 = vmatmul.mubr.f32.vlgmr.msra.gmra.mxu1 %v4986_v61 }
 0x92d   :  { %6157 = vmatpush3.msra.mxu1 %v6864_v55  ;;  %v4978_v4 = vand.u32 4294901760, %v4977_v10  ;;  %v4989_v14 = vsub.f32 %v4987_v23, %v4988_v21 }
 0x92e   :  { %6158 = vmatprep.subr.mxu1 %v6876_v57 }
 0x92f   :  { %6159 = vmatpush3.msra.mxu1 %v6876_v57  ;;  %6164 = vmatprep.mubr.f32.mxu1 %v4978_v4  ;;  %v4979_v24 = vsub.f32 %v4977_v10, %v4978_v4  ;;  %v4990_v7 = vand.u32 4294901760, %v4989_v14 }
 0x930   :  { %6160 = vmatprep.subr.mxu1 %v6881_v59 }
 0x931   :  { %6161 = vmatpush3.msra.mxu1 %v6881_v59  ;;  %v4980_v6 = vand.u32 4294901760, %v4979_v24 }
 0x932   :  { %6162 = vmatprep.subr.mxu1 %v6891_v0 }
 0x933   :  { %6163 = vmatpush3.msra.mxu1 %v6891_v0  ;;  %6131 = vmatprep.mubr.f32.mxu0 %v4980_v6 }
 0x934   :  { %6165 = vmatmul.mubr.f32.vlgmr.msra.gmra.mxu1 %v4988_v21  ;;  %6178 = vmatprep.subr.mxu1 %v6864_v55 }
 0x935   :  { %6132 = vmatmul.mubr.f32.vlgmr.msra.gmra.mxu0 %v4990_v7  ;;  %6179 = vmatpush3.msra.mxu1 %v6864_v55 }
 0x936   :  { %6146 = vmatpush3.msra.mxu0 %v6867_v18  ;;  %6186 = vmatprep.mubr.f32.mxu1 %v4976_v1 }
 0x937   :  { %6147 = vmatprep.subr.mxu0 %v6879_v58  ;;  %6153 = vmatprep.mubr.f32.mxu0 %v4977_v10 }
 0x938   :  { %6180 = vmatprep.subr.mxu1 %v6876_v57  ;;  %6148 = vmatpush3.msra.mxu0 %v6879_v58 }
 0x939   :  { %6181 = vmatpush3.msra.mxu1 %v6876_v57  ;;  %6149 = vmatprep.subr.mxu0 %v6889_v62 }
 0x93a   :  { %6182 = vmatprep.subr.mxu1 %v6881_v59  ;;  %6150 = vmatpush3.msra.mxu0 %v6889_v62 }
 0x93b   :  { %6183 = vmatpush3.msra.mxu1 %v6881_v59  ;;  %6151 = vmatprep.subr.mxu0 %v6901_v3 }
 0x93c   :  { %6184 = vmatprep.subr.mxu1 %v6891_v0  ;;  %6152 = vmatpush3.msra.mxu0 %v6901_v3 }
 0x93d   :  { %6185 = vmatpush3.msra.mxu1 %v6891_v0  ;;  %6154 = vmatmul.mubr.f32.vlgmr.msra.gmra.mxu0 %v4987_v23 }
 0x93e   :  { %6167 = vmatprep.subr.mxu0 %v6872_v25  ;;  %6187 = vmatmul.mubr.f32.vlgmr.msra.gmra.mxu1 %v4986_v61 }
 0x93f   :  { %6168 = vmatpush3.msra.mxu0 %v6872_v25  ;;  %6175 = vmatprep.mubr.f32.mxu0 %v4976_v1 }
 0x940   :  { %6169 = vmatprep.subr.mxu0 %v6886_v2 }
 0x941   :  { %6170 = vmatpush3.msra.mxu0 %v6886_v2 }
 0x942   :  { %6171 = vmatprep.subr.mxu0 %v6898_v16 }
 0x943   :  { %6172 = vmatpush3.msra.mxu0 %v6898_v16 }
 0x944   :  { %6173 = vmatprep.subr.mxu0 %v6908_v5 }
 0x945   :  { %6174 = vmatpush3.msra.mxu0 %v6908_v5 }
 0x946   :  { %6176 = vmatmul.mubr.f32.vlgmr.msra.gmra.mxu0 %v4986_v61 }
 0x9ec   :  { %v6144_v18 = vpop.f32.mrf.mxu1 }
 0x9ee   :  { %v5083_v59 = vpop.f32.mrf.mxu1 }
 0x9f4   :  { %v6166_v62 = vpop.f32.mrf.mxu1 }
 0x9f5   :  { %v6133_v55 = vpop.f32.mrf.mxu0 }
 0x9f6   :  { %v5090_v25 = vadd.f32 %v6144_v18, %v6133_v55  ;;  %v5253_v9 = vpop.f32.mrf.mxu1 }
 0x9f7   :  { %v4982_v57 = vpop.f32.mrf.mxu0 }
 0x9f8   :  { %v5084_v3 = vadd.f32 %v5083_v59, %v4982_v57 }
 0x9fd   :  { %v6155_v58 = vpop.f32.mrf.mxu0 }
 0x9fe   :  { %v5177_v8 = vadd.f32 %v6155_v58, %v5090_v25  ;;  %v6188_v12 = vpop.f32.mrf.mxu1 }
 0x9ff   :  { %v5169_v0 = vpop.f32.mrf.mxu0 }
 0xa00   :  { %v5170_v2 = vadd.f32 %v5169_v0, %v5084_v3  ;;  %v5262_v11 = vadd.f32 %v6166_v62, %v5177_v8  ;;  %v5425_v29 = vpop.f32.mrf.mxu1 }
 0xa02   :  { %v5254_v15 = vadd.f32 %v5253_v9, %v5170_v2 }
 0xa06   :  { %v6177_v16 = vpop.f32.mrf.mxu0 }
 0xa07   :  { %v5351_v13 = vadd.f32 %v6177_v16, %v5262_v11 }
 0xa08   :  { %v5344_v20 = vpop.f32.mrf.mxu0 }
 0xa09   :  { %v5432_v5 = vadd.f32 %v6188_v12, %v5351_v13  ;;  %v5345_v26 = vadd.f32 %v5344_v20, %v5254_v15 }
 0xa0b   :  { %5436 = vst.msk [vmem:[#allocation11 + $0x8] sm:$0xff] %vm109_vm0, %v5432_v5  ;;  %v5426_v30 = vadd.f32 %v5425_v29, %v5345_v26 }
 0xa0d   :  { %5435 = vst.msk [vmem:[#allocation11] sm:$0xff] %vm109_vm0, %v5426_v30 }
 0xa0e   :  { %6355 = shalt.err (!%p6352_p1)
}
 0xa0f   :  { %5448 = dma.vmem_to_hbm [thread:$0]  %s5443_s12, 256, %s6966_s6, [#allocation4], %s6374_s26, %s6374_s26, %s6375_s27  }
 0xa10   :  { %6370 = dma.done.wait [#allocation4], 256  }
 0xa11   :  { %6371 = vsyncadd [#allocation4], 4294967040 }
 0xa12   :  { %5452 = vsyncpa [#allocation3], 1 }
 0xa13   :  { %5453 = vsyncpa [#allocation6], 1 }
 0xa14   :  { %5454 = vsyncpa [#allocation9], 1 }
 0xa15   :  { %5455 = vsyncpa [#allocation4], 1 }

</bundles_post_ra>
